<compile_context>
chip_gen: v5e
topology: v5e:2x2
jax: 0.10.0
libtpu: 0.0.40
codegen_flags: <defaults>
</compile_context>

<pallas_src>
import functools
import math

import jax
import jax.numpy as jnp
from jax import lax
from jax.experimental import pallas as pl
from jax.experimental.pallas import tpu as pltpu


_INV_SQRT2 = 1.0 / math.sqrt(2.0)


def _round_up(x: int, m: int) -> int:
    return ((x + m - 1) // m) * m


# --------------------------------------------------------------------------
# Hardware introspection
# --------------------------------------------------------------------------
def _tpu_env():
    """(per-core VMEM bytes, lowercase device kind). Conservative fallbacks."""
    try:
        vmem = int(pltpu.get_tpu_info().vmem_capacity_bytes)
    except Exception:
        vmem = 64 * 1024 * 1024           # assume the smallest (v7x per-TC) VMEM
    try:
        kind = jax.devices()[0].device_kind.lower()
    except Exception:
        kind = ""
    return vmem, kind


def _probe_kernel(x_ref, o_ref):
    o_ref[...] = x_ref[...] + 1.0


@functools.lru_cache(maxsize=1)
def _single_buffer_supported() -> bool:
    """One-time feature probe: does this JAX/Mosaic accept pl.Buffered(1)?

    Compiles a trivial kernel once; the result is cached.  This replaces the
    previous blanket try/except around the real pallas_call, which could mask
    genuine lowering / VMEM errors.
    """
    if not hasattr(pl, "Buffered"):
        return False
    try:
        spec = pl.BlockSpec((8, 128), lambda i: (0, 0), pipeline_mode=pl.Buffered(1))
        fn = pl.pallas_call(
            _probe_kernel,
            out_shape=jax.ShapeDtypeStruct((8, 128), jnp.float32),
            grid_spec=pltpu.PrefetchScalarGridSpec(
                num_scalar_prefetch=0,
                grid=(1,),
                in_specs=[spec],
                out_specs=pl.BlockSpec((8, 128), lambda i: (0, 0)),
            ),
        )
        jax.block_until_ready(fn(jnp.zeros((8, 128), jnp.float32)))
        return True
    except Exception:
        return False


# --------------------------------------------------------------------------
# Kernel bodies
# --------------------------------------------------------------------------
def _gelu(h, approximate: bool):
    if approximate:
        # tanh-approx GELU: EUP tanh slot (cheap on v5e where erf is a long
        # f32 VPU polynomial chain competing for the 4 VALU slots).
        c = math.sqrt(2.0 / math.pi)
        return 0.5 * h * (1.0 + jnp.tanh(c * (h + 0.044715 * h * h * h)))
    # exact erf GELU -- matches torch.nn.GELU() default.
    return 0.5 * h * (1.0 + lax.erf(h * _INV_SQRT2))


def _cmlp_single_k(x_ref, w1_ref, b1_ref, w2_ref, b2_ref, o_ref,
                   *, approximate_gelu: bool, compute_dtype):
    # Whole hidden dim resident: no accumulator scratch, write straight out.
    x = x_ref[...].astype(compute_dtype)                      # cast in-kernel
    h = jnp.dot(x, w1_ref[...], preferred_element_type=jnp.float32)
    h = h + b1_ref[...]                                       # bias in f32
    h = _gelu(h, approximate_gelu)                            # dropout p=0 -> identity
    y = jnp.dot(h.astype(compute_dtype), w2_ref[...],
                preferred_element_type=jnp.float32)
    o_ref[...] = (y + b2_ref[...]).astype(o_ref.dtype)


def _cmlp_multi_k(x_ref, w1_ref, b1_ref, w2_ref, b2_ref, o_ref, acc_ref,
                  *, approximate_gelu: bool, compute_dtype):
    k = pl.program_id(1)

    @pl.when(k == 0)
    def _init():
        acc_ref[...] = jnp.zeros_like(acc_ref)

    x = x_ref[...].astype(compute_dtype)
    h = jnp.dot(x, w1_ref[...], preferred_element_type=jnp.float32)
    h = h + b1_ref[...]
    h = _gelu(h, approximate_gelu)
    acc_ref[...] += jnp.dot(h.astype(compute_dtype), w2_ref[...],
                            preferred_element_type=jnp.float32)

    @pl.when(k == pl.num_programs(1) - 1)
    def _finalize():
        o_ref[...] = (acc_ref[...] + b2_ref[...]).astype(o_ref.dtype)


# --------------------------------------------------------------------------
# Tile-geometry selection
# --------------------------------------------------------------------------
def _select_geometry(M, C, H, Cout, x_itemsize, compute_itemsize, out_itemsize,
                     budget, multi_tc, gran, tm_max):
    Cp = _round_up(C, 128)
    Coutp = _round_up(Cout, 128)
    Hp = _round_up(H, 128)
    Mp128 = _round_up(M, 128)

    def est(tm, th, n_kt, single_buf):
        wbuf = 1 if (n_kt == 1 and single_buf) else 2
        e = (2 * tm * Cp * x_itemsize                 # x tile (double-buffered, orig dtype)
             + wbuf * Cp * th * compute_itemsize      # w1 slab
             + wbuf * th * Coutp * compute_itemsize   # w2 slab
             + wbuf * 8 * th * 4 + 2 * 8 * Coutp * 4  # biases (8-sublane padded)
             + 2 * tm * Coutp * out_itemsize          # output tiles
             + tm * th * 4                            # f32 hidden intermediate
             + tm * Coutp * 4)                        # f32 fc2 result
        if n_kt > 1:
            e += tm * Coutp * 4                       # f32 accumulator scratch
        return e

    tm_max = max(128, (tm_max // 128) * 128)
    tm = min(tm_max, Mp128)
    if multi_tc and Mp128 >= 256:
        # >= 2 row tiles so the "parallel" row axis feeds both v7x TensorCores.
        tm = min(tm, max(128, (Mp128 // 2 // 128) * 128))

    divisors = [d for d in range(128, Hp + 1, 128) if Hp % d == 0]

    def choose(tm):
        # 1) weights-resident with plain double-buffering (no probe needed).
        if est(tm, Hp, 1, single_buf=False) <= budget:
            return Hp, 1, False
        # 2) weights-resident only if single-buffered constant blocks work.
        if est(tm, Hp, 1, single_buf=True) <= budget and _single_buffer_supported():
            return Hp, 1, True
        # 3) k-tile the hidden axis: largest dividing chunk that fits,
        #    preferring multiples of `gran` (256 on v6e/v7x 2x256 MXUs).
        fitting = [d for d in divisors
                   if d < Hp and est(tm, d, Hp // d, False) <= budget]
        if fitting:
            pref = [d for d in fitting if d % gran == 0]
            th = max(pref) if pref else max(fitting)
        else:
            th = 128
        return th, Hp // th, False

    th, n_kt, single_buf = choose(tm)
    while est(tm, th, n_kt, single_buf) > budget and tm > 128:
        tm = max(128, (tm // 2 // 128) * 128)
        th, n_kt, single_buf = choose(tm)

    Mp = _round_up(M, tm)
    return Cp, Hp, Coutp, tm, Mp, th, n_kt, single_buf


# --------------------------------------------------------------------------
# Public API
# --------------------------------------------------------------------------
def prepare_params(w1, b1, w2, b2, compute_dtype=jnp.bfloat16):
    """Pad + cast the (static) CMlp parameters ONCE.

    w1: [C_in, H], b1: [H], w2: [H, C_out], b2: [C_out]
    (weights stored transposed vs. PyTorch's [out, in]).
    Zero padding is exact: padded rows/cols contribute 0 to the matmuls.
    """
    C, H = w1.shape
    H2, Cout = w2.shape
    assert H2 == H and b1.shape == (H,) and b2.shape == (Cout,)
    Cp, Hp, Coutp = _round_up(C, 128), _round_up(H, 128), _round_up(Cout, 128)
    return dict(
        w1=jnp.pad(w1, ((0, Cp - C), (0, Hp - H))).astype(compute_dtype),
        w2=jnp.pad(w2, ((0, Hp - H), (0, Coutp - Cout))).astype(compute_dtype),
        b1=jnp.pad(b1, (0, Hp - H)).astype(jnp.float32).reshape(1, Hp),
        b2=jnp.pad(b2, (0, Coutp - Cout)).astype(jnp.float32).reshape(1, Coutp),
        C=C, H=H, Cout=Cout, compute_dtype=compute_dtype,
    )


def cmlp(x, params, *, tm_max=512, approximate_gelu=None):
    """Fused CMlp forward: y = fc2(GELU(fc1(x))) over the last axis.

    x: [B, N, C_in] (channels-last, as nn.Linear sees it).
    params: output of prepare_params().
    """
    B, N, C = x.shape
    assert C == params["C"], "x channel dim does not match prepared params"
    H, Cout = params["H"], params["Cout"]
    w1p, b1p, w2p, b2p = params["w1"], params["b1"], params["w2"], params["b2"]
    compute_dtype = params["compute_dtype"]

    M = B * N
    out_dtype = x.dtype
    xi = jnp.dtype(x.dtype).itemsize
    cd = jnp.dtype(compute_dtype).itemsize
    ob = jnp.dtype(out_dtype).itemsize

    vmem_cap, kind = _tpu_env()
    is_v5e = ("v5 lite" in kind) or ("v5e" in kind) or ("v5litepod" in kind)
    multi_tc = "v7" in kind                 # v7x: 2 TensorCores share the chip
    if approximate_gelu is None:
        approximate_gelu = is_v5e
    gran = 128 if is_v5e else 256           # contraction-chunk granularity
    budget = int(0.80 * vmem_cap)           # headroom for Mosaic scratch/semaphores

    Cp, Hp, Coutp, tm, Mp, th, n_kt, single_buf = _select_geometry(
        M, C, H, Cout, xi, cd, ob, budget, multi_tc, gran, tm_max)
    assert w1p.shape == (Cp, Hp) and w2p.shape == (Hp, Coutp)

    # Pad x only where needed; the cast to the MXU dtype happens in-kernel, so
    # there is no extra per-call HBM pass just to change dtype.
    x2 = x.reshape(M, C)
    if Mp != M or Cp != C:
        x2 = jnp.pad(x2, ((0, Mp - M), (0, Cp - C)))

    def resident_spec(shape, index_map):
        if single_buf:
            # Constant block index => nothing to prefetch; one VMEM copy only.
            return pl.BlockSpec(shape, index_map, pipeline_mode=pl.Buffered(1))
        return pl.BlockSpec(shape, index_map)

    if n_kt == 1:
        kernel = functools.partial(_cmlp_single_k,
                                   approximate_gelu=approximate_gelu,
                                   compute_dtype=compute_dtype)
        grid = (Mp // tm,)
        in_specs = [
            pl.BlockSpec((tm, Cp), lambda i: (i, 0)),          # x rows (streamed)
            resident_spec((Cp, Hp), lambda i: (0, 0)),          # w1 (resident)
            resident_spec((1, Hp), lambda i: (0, 0)),           # b1
            resident_spec((Hp, Coutp), lambda i: (0, 0)),       # w2 (resident)
            resident_spec((1, Coutp), lambda i: (0, 0)),        # b2
        ]
        out_specs = pl.BlockSpec((tm, Coutp), lambda i: (i, 0))
        scratch = []
        dims = ("parallel",)
    else:
        kernel = functools.partial(_cmlp_multi_k,
                                   approximate_gelu=approximate_gelu,
                                   compute_dtype=compute_dtype)
        grid = (Mp // tm, n_kt)   # rows [parallel], hidden chunks [arbitrary]
        in_specs = [
            pl.BlockSpec((tm, Cp), lambda i, k: (i, 0)),        # x rows (index constant over k)
            pl.BlockSpec((Cp, th), lambda i, k: (0, k)),        # w1 slice
            pl.BlockSpec((1, th), lambda i, k: (0, k)),         # b1 slice
            pl.BlockSpec((th, Coutp), lambda i, k: (k, 0)),     # w2 slice
            pl.BlockSpec((1, Coutp), lambda i, k: (0, 0)),      # b2
        ]
        out_specs = pl.BlockSpec((tm, Coutp), lambda i, k: (i, 0))
        scratch = [pltpu.VMEM((tm, Coutp), jnp.float32)]        # f32 accumulator
        dims = ("parallel", "arbitrary")

    out = pl.pallas_call(
        kernel,
        out_shape=jax.ShapeDtypeStruct((Mp, Coutp), out_dtype),
        grid_spec=pltpu.PrefetchScalarGridSpec(
            num_scalar_prefetch=0,
            grid=grid,
            in_specs=in_specs,
            out_specs=out_specs,
            scratch_shapes=scratch,
        ),
        compiler_params=pltpu.CompilerParams(
            dimension_semantics=dims,
            vmem_limit_bytes=budget,
        ),
    )(x2, w1p, b1p, w2p, b2p)

    return out[:M, :Cout].reshape(B, N, Cout)


def init_params(key, in_features, hidden_features, out_features, dtype=jnp.float32):
    """Deterministic init mimicking nn.Linear's default U(-1/sqrt(fan_in), 1/sqrt(fan_in))."""
    k1, k2, k3, k4 = jax.random.split(key, 4)
    lim1 = 1.0 / math.sqrt(in_features)
    lim2 = 1.0 / math.sqrt(hidden_features)
    w1 = jax.random.uniform(k1, (in_features, hidden_features),
                            minval=-lim1, maxval=lim1, dtype=dtype)
    b1 = jax.random.uniform(k2, (hidden_features,), minval=-lim1, maxval=lim1, dtype=dtype)
    w2 = jax.random.uniform(k3, (hidden_features, out_features),
                            minval=-lim2, maxval=lim2, dtype=dtype)
    b2 = jax.random.uniform(k4, (out_features,), minval=-lim2, maxval=lim2, dtype=dtype)
    return w1, b1, w2, b2


if __name__ == "__main__":
    key = jax.random.PRNGKey(0)
    kx, kp = jax.random.split(key)

    # Small shapes consistent with CMlp inside AttnCBlock (hidden = 4 * dim).
    B, N, C_in = 2, 8, 32
    hidden = 4 * C_in
    C_out = C_in

    x = jax.random.normal(kx, (B, N, C_in), dtype=jnp.float32)
    w1, b1, w2, b2 = init_params(kp, C_in, hidden, C_out)

    params = prepare_params(w1, b1, w2, b2)      # pad + cast ONCE (static weights)
    out = cmlp(x, params)
    out = jax.block_until_ready(out)
    assert out.shape == (B, N, C_out)

    # Pure-JAX reference mirroring the kernel's numerics (bf16 MXU inputs, f32
    # accumulation, exact-erf GELU; the v5e tanh-GELU default stays well inside
    # the tolerance).
    xb = x.reshape(B * N, C_in).astype(jnp.bfloat16)
    h_ref = jnp.dot(xb, w1.astype(jnp.bfloat16), preferred_element_type=jnp.float32) + b1
    h_ref = 0.5 * h_ref * (1.0 + lax.erf(h_ref * _INV_SQRT2))
    y_ref = jnp.dot(h_ref.astype(jnp.bfloat16), w2.astype(jnp.bfloat16),
                    preferred_element_type=jnp.float32) + b2
    ref = y_ref.astype(x.dtype).reshape(B, N, C_out)

    assert jnp.allclose(out, ref, atol=2e-2, rtol=2e-2), "mismatch vs reference"

    print("KERNEL_OK")
</pallas_src>

<mosaic_0001>
module attributes {stable_mosaic.version = 11 : i64} {
  func.func @_cmlp_single_k(%arg0: i32, %arg1: memref<128x128xf32, #tpu.memory_space<vmem>>, %arg2: memref<128x128xbf16, #tpu.memory_space<vmem>>, %arg3: memref<1x128xf32, #tpu.memory_space<vmem>>, %arg4: memref<128x128xbf16, #tpu.memory_space<vmem>>, %arg5: memref<1x128xf32, #tpu.memory_space<vmem>>, %arg6: memref<128x128xf32, #tpu.memory_space<vmem>>) attributes {dimension_semantics = [#tpu.dimension_semantics<parallel>], iteration_bounds = array<i64: 1>, scalar_prefetch = 0 : i64, scratch_operands = 0 : i64, tpu.core_type = #tpu.core_type<tc>, window_params = [{transform_indices = @transform_0, window_bounds = array<i64: 128, 128>}, {pipeline_mode = #tpu.pipeline_mode<synchronous>, transform_indices = @transform_1, window_bounds = array<i64: 128, 128>}, {pipeline_mode = #tpu.pipeline_mode<synchronous>, transform_indices = @transform_2, window_bounds = array<i64: 1, 128>}, {pipeline_mode = #tpu.pipeline_mode<synchronous>, transform_indices = @transform_3, window_bounds = array<i64: 128, 128>}, {pipeline_mode = #tpu.pipeline_mode<synchronous>, transform_indices = @transform_4, window_bounds = array<i64: 1, 128>}, {transform_indices = @transform_5, window_bounds = array<i64: 128, 128>}]} {
    %c0 = arith.constant 0 : index
    %c0_0 = arith.constant 0 : index
    %0 = vector.load %arg1[%c0, %c0_0] : memref<128x128xf32, #tpu.memory_space<vmem>>, vector<128x128xf32>
    %1 = arith.truncf %0 : vector<128x128xf32> to vector<128x128xbf16>
    %c0_1 = arith.constant 0 : index
    %c0_2 = arith.constant 0 : index
    %2 = vector.load %arg2[%c0_1, %c0_2] : memref<128x128xbf16, #tpu.memory_space<vmem>>, vector<128x128xbf16>
    %cst = arith.constant dense<0.000000e+00> : vector<128x128xf32>
    %3 = tpu.matmul %1, %2, %cst {dimension_numbers = #tpu.dot_dimension_numbers<[1], [0], [0], [1], [0, 0, 1, 1], [], []>} : vector<128x128xbf16>, vector<128x128xbf16>, vector<128x128xf32> -> vector<128x128xf32>
    %c0_3 = arith.constant 0 : index
    %c0_4 = arith.constant 0 : index
    %4 = vector.load %arg3[%c0_3, %c0_4] : memref<1x128xf32, #tpu.memory_space<vmem>>, vector<1x128xf32>
    %5 = vector.broadcast %4 : vector<1x128xf32> to vector<128x128xf32>
    %6 = arith.addf %3, %5 : vector<128x128xf32>
    %cst_5 = arith.constant 5.000000e-01 : f32
    %7 = vector.broadcast %cst_5 : f32 to vector<128x128xf32>
    %8 = arith.mulf %7, %6 : vector<128x128xf32>
    %cst_6 = arith.constant 0.707106769 : f32
    %9 = vector.broadcast %cst_6 : f32 to vector<128x128xf32>
    %10 = arith.mulf %6, %9 : vector<128x128xf32>
    %11 = math.erf %10 : vector<128x128xf32>
    %cst_7 = arith.constant 1.000000e+00 : f32
    %12 = vector.broadcast %cst_7 : f32 to vector<128x128xf32>
    %13 = arith.addf %12, %11 : vector<128x128xf32>
    %14 = arith.mulf %8, %13 : vector<128x128xf32>
    %15 = arith.truncf %14 : vector<128x128xf32> to vector<128x128xbf16>
    %c0_8 = arith.constant 0 : index
    %c0_9 = arith.constant 0 : index
    %16 = vector.load %arg4[%c0_8, %c0_9] : memref<128x128xbf16, #tpu.memory_space<vmem>>, vector<128x128xbf16>
    %cst_10 = arith.constant dense<0.000000e+00> : vector<128x128xf32>
    %17 = tpu.matmul %15, %16, %cst_10 {dimension_numbers = #tpu.dot_dimension_numbers<[1], [0], [0], [1], [0, 0, 1, 1], [], []>} : vector<128x128xbf16>, vector<128x128xbf16>, vector<128x128xf32> -> vector<128x128xf32>
    %c0_11 = arith.constant 0 : index
    %c0_12 = arith.constant 0 : index
    %18 = vector.load %arg5[%c0_11, %c0_12] : memref<1x128xf32, #tpu.memory_space<vmem>>, vector<1x128xf32>
    %19 = vector.broadcast %18 : vector<1x128xf32> to vector<128x128xf32>
    %20 = arith.addf %17, %19 : vector<128x128xf32>
    %c0_13 = arith.constant 0 : index
    %c0_14 = arith.constant 0 : index
    %21 = vector.load %arg6[%c0_13, %c0_14] : memref<128x128xf32, #tpu.memory_space<vmem>>, vector<128x128xf32>
    tpu.vector_store %arg6[%c0_13, %c0_14], %20 {strides = array<i32>} : memref<128x128xf32, #tpu.memory_space<vmem>>, vector<128x128xf32>,
    return
  }
  func.func @transform_0(%arg0: i32) -> (i32, i32) {
    %c0_i32 = arith.constant 0 : i32
    %c0_i32_0 = arith.constant 0 : i32
    return %arg0, %c0_i32 : i32, i32
  }
  func.func @transform_1(%arg0: i32) -> (i32, i32) {
    %c0_i32 = arith.constant 0 : i32
    %c0_i32_0 = arith.constant 0 : i32
    %c0_i32_1 = arith.constant 0 : i32
    return %c0_i32, %c0_i32_0 : i32, i32
  }
  func.func @transform_2(%arg0: i32) -> (i32, i32) {
    %c0_i32 = arith.constant 0 : i32
    %c0_i32_0 = arith.constant 0 : i32
    %c0_i32_1 = arith.constant 0 : i32
    return %c0_i32, %c0_i32_0 : i32, i32
  }
  func.func @transform_3(%arg0: i32) -> (i32, i32) {
    %c0_i32 = arith.constant 0 : i32
    %c0_i32_0 = arith.constant 0 : i32
    %c0_i32_1 = arith.constant 0 : i32
    return %c0_i32, %c0_i32_0 : i32, i32
  }
  func.func @transform_4(%arg0: i32) -> (i32, i32) {
    %c0_i32 = arith.constant 0 : i32
    %c0_i32_0 = arith.constant 0 : i32
    %c0_i32_1 = arith.constant 0 : i32
    return %c0_i32, %c0_i32_0 : i32, i32
  }
  func.func @transform_5(%arg0: i32) -> (i32, i32) {
    %c0_i32 = arith.constant 0 : i32
    %c0_i32_0 = arith.constant 0 : i32
    return %arg0, %c0_i32 : i32, i32
  }
}

</mosaic_0001>

<bundles_post_ra>
// kernel: tpu_custom_call.1
= control target key start
LH: loop header
LB: loop body
LE: loop exit
PB: predicated region body
PF: predicated region fallthrough
CT: control target
= control target key end

     0   :  { %10 = vsyncpa [#allocation3], 0  ;;  %s2052_s0 = inlined_call_operand.hbm [shape: f32[128,128], index: 0, kind: input, shape index: {}]   ;;  %s2053_s1 = inlined_call_operand.hbm [shape: bf16[128,128], index: 1, kind: input, shape index: {}]   ;;  %s2054_s2 = inlined_call_operand.vmem [shape: f32[1,128], index: 2, kind: input, shape index: {}]   ;;  %s2055_s3 = inlined_call_operand.hbm [shape: bf16[128,128], index: 3, kind: input, shape index: {}]   ;;  %s2056_s4 = inlined_call_operand.vmem [shape: f32[1,128], index: 4, kind: input, shape index: {}]   ;;  %s2057_s5 = inlined_call_operand.hbm [shape: f32[128,128], index: 5, kind: output, shape index: {}]  }
   0x1   :  { %11 = vsyncpa [#allocation6], 0  ;;  %s30_s20 = sshll.u32 %s2053_s1, 4  ;;  %s31_s20 = int_to_ptr.hbm [resolvable:$true] %s30_s20 }
   0x2   :  { %12 = vsyncpa [#allocation4], 0  ;;  %s1330_s21 = smov [#allocation5]   ;;  %s17_s25 = sshll.u32 %s2052_s0, 4  ;;  %s18_s25 = int_to_ptr.hbm [resolvable:$true] %s17_s25 }
   0x3   :  { %s32_s22 = sshll.u32 %s1330_s21, 4  ;;  %s1331_s26 = smov 64   ;;  %s33_s22 = int_to_ptr.vmem [resolvable:$true] %s32_s22 }
   0x4   :  { %s1332_s27 = smov 4   ;;  %s1333_s28 = smov [#allocation2]  }
   0x5   :  { %38 = dma.hbm_to_vmem [thread:$0]  %s31_s20, 1024, %s33_s22, [#allocation6], %s1331_s26, %s1331_s26, %s1332_s27  }
   0x6   :  { %s19_s29 = sshll.u32 %s1333_s28, 4  ;;  %s1334_s30 = smov 128   ;;  %s20_s29 = int_to_ptr.vmem [resolvable:$true] %s19_s29 }
   0x7   :  { %s1335_s6 = smov 8   ;;  %s45_s8 = sshll.u32 %s2055_s3, 4  ;;  %s46_s8 = int_to_ptr.hbm [resolvable:$true] %s45_s8 }
   0x8   :  { %25 = dma.hbm_to_vmem [thread:$0]  %s18_s25, 2048, %s20_s29, [#allocation3], %s1334_s30, %s1334_s30, %s1335_s6  }
   0x9   :  { %s1336_s9 = smov [#allocation7]  }
   0xa   :  { %s47_s0 = sshll.u32 %s1336_s9, 4  ;;  %s48_s0 = int_to_ptr.vmem [resolvable:$true] %s47_s0 }
   0xb   :  { %53 = dma.hbm_to_vmem [thread:$0]  %s46_s8, 1024, %s48_s0, [#allocation6], %s1331_s26, %s1331_s26, %s1332_s27  }
   0xc   :  { %1324 = dma.done.wait [#allocation3], 2048  }
   0xd   :  { %1325 = vsyncadd [#allocation3], 4294965248 }
   0xe   :  { %1326 = dma.done.wait [#allocation6], 2048  }
   0xf   :  { %1327 = vsyncadd [#allocation6], 4294965248  ;;  %v1161_v0 = vld [vmem:[#allocation5 + $0x38] sm:$0xff]  ;;  %v1160_v1 = vld [vmem:[#allocation5 + $0x30] sm:$0xff]  ;;  %s1060_s15 = sshll.u32 %s2057_s5, 4  ;;  %s1061_s15 = int_to_ptr.hbm [resolvable:$true] %s1060_s15 }
  0x10   :  { %160 = vmatpush.bf16.msra.mxu0 %v1161_v0  ;;  %1170 = vmatpush.bf16.msra.mxu2 %v1161_v0  ;;  %v1159_v2 = vld [vmem:[#allocation5 + $0x28] sm:$0xff]  ;;  %v1158_v3 = vld [vmem:[#allocation5 + $0x20] sm:$0xff]  ;;  %v1157_v4 = vld [vmem:[#allocation5 + $0x18] sm:$0xff] }
  0x11   :  { %v1156_v5 = vld [vmem:[#allocation5 + $0x10] sm:$0xff]  ;;  %v1155_v6 = vld [vmem:[#allocation5 + $0x8] sm:$0xff]  ;;  %v1154_v7 = vld [vmem:[#allocation5] sm:$0xff] }
  0x12   :  { %v68_v8 = vld [vmem:[#allocation2] sm:$0xff]  ;;  %v69_v9 = vld [vmem:[#allocation2 + $0x8] sm:$0xff]  ;;  %v70_v14 = vld [vmem:[#allocation2 + $0x10] sm:$0xff] }
  0x13   :  { %v76_v10 = vld [vmem:[#allocation2 + $0x40] sm:$0xff]  ;;  %v77_v11 = vld [vmem:[#allocation2 + $0x48] sm:$0xff]  ;;  %v84_v12 = vpack.c.bf16 %v69_v9, %v68_v8  ;;  %v71_v15 = vld [vmem:[#allocation2 + $0x18] sm:$0xff] }
  0x14   :  { %161 = vmatpush.bf16.msra.mxu0 %v1160_v1  ;;  %1171 = vmatpush.bf16.msra.mxu2 %v1160_v1  ;;  %v88_v13 = vpack.c.bf16 %v77_v11, %v76_v10  ;;  %v78_v16 = vld [vmem:[#allocation2 + $0x50] sm:$0xff]  ;;  %v79_v17 = vld [vmem:[#allocation2 + $0x58] sm:$0xff]  ;;  %v85_v18 = vpack.c.bf16 %v71_v15, %v70_v14  ;;  %v72_v20 = vld [vmem:[#allocation2 + $0x20] sm:$0xff] }
  0x15   :  { %v89_v19 = vpack.c.bf16 %v79_v17, %v78_v16  ;;  %v73_v21 = vld [vmem:[#allocation2 + $0x28] sm:$0xff]  ;;  %v80_v22 = vld [vmem:[#allocation2 + $0x60] sm:$0xff]  ;;  %v74_v26 = vld [vmem:[#allocation2 + $0x30] sm:$0xff] }
  0x16   :  { %v81_v23 = vld [vmem:[#allocation2 + $0x68] sm:$0xff]  ;;  %v86_v24 = vpack.c.bf16 %v73_v21, %v72_v20  ;;  %v75_v27 = vld [vmem:[#allocation2 + $0x38] sm:$0xff]  ;;  %v82_v28 = vld [vmem:[#allocation2 + $0x70] sm:$0xff] }
  0x17   :  { %v90_v25 = vpack.c.bf16 %v81_v23, %v80_v22  ;;  %v83_v29 = vld [vmem:[#allocation2 + $0x78] sm:$0xff]  ;;  %v87_v30 = vpack.c.bf16 %v75_v27, %v74_v26  ;;  %v1383_v32 = vld [vmem:[%s2054_s2] ss:$0 sm:$0xff]  ;;  %v1168_v38 = vld [vmem:[#allocation7 + $0x30] sm:$0xff] }
  0x18   :  { %162 = vmatpush.bf16.msra.mxu0 %v1159_v2  ;;  %1172 = vmatpush.bf16.msra.mxu2 %v1159_v2  ;;  %v91_v31 = vpack.c.bf16 %v83_v29, %v82_v28  ;;  %v1169_v35 = vld [vmem:[#allocation7 + $0x38] sm:$0xff]  ;;  %v1167_v46 = vld [vmem:[#allocation7 + $0x28] sm:$0xff]  ;;  %v1166_v54 = vld [vmem:[#allocation7 + $0x20] sm:$0xff] }
  0x19   :  { %989 = vmatpush.bf16.msra.mxu1 %v1169_v35  ;;  %1178 = vmatpush.bf16.msra.mxu3 %v1169_v35  ;;  %v1165_v0 = vld [vmem:[#allocation7 + $0x18] sm:$0xff]  ;;  %v1164_v9 = vld [vmem:[#allocation7 + $0x10] sm:$0xff]  ;;  %v1163_v20 = vld [vmem:[#allocation7 + $0x8] sm:$0xff] }
  0x1c   :  { %163 = vmatpush.bf16.msra.mxu0 %v1158_v3  ;;  %1173 = vmatpush.bf16.msra.mxu2 %v1158_v3 }
  0x1d   :  { %990 = vmatpush.bf16.msra.mxu1 %v1168_v38  ;;  %1179 = vmatpush.bf16.msra.mxu3 %v1168_v38 }
  0x20   :  { %164 = vmatpush.bf16.msra.mxu0 %v1157_v4  ;;  %1174 = vmatpush.bf16.msra.mxu2 %v1157_v4 }
  0x21   :  { %991 = vmatpush.bf16.msra.mxu1 %v1167_v46  ;;  %1180 = vmatpush.bf16.msra.mxu3 %v1167_v46 }
  0x24   :  { %165 = vmatpush.bf16.msra.mxu0 %v1156_v5  ;;  %1175 = vmatpush.bf16.msra.mxu2 %v1156_v5 }
  0x25   :  { %992 = vmatpush.bf16.msra.mxu1 %v1166_v54  ;;  %1181 = vmatpush.bf16.msra.mxu3 %v1166_v54 }
  0x28   :  { %166 = vmatpush.bf16.msra.mxu0 %v1155_v6  ;;  %1176 = vmatpush.bf16.msra.mxu2 %v1155_v6 }
  0x29   :  { %993 = vmatpush.bf16.msra.mxu1 %v1165_v0  ;;  %1182 = vmatpush.bf16.msra.mxu3 %v1165_v0 }
  0x2c   :  { %167 = vmatpush.bf16.msra.mxu0 %v1154_v7  ;;  %1177 = vmatpush.bf16.msra.mxu2 %v1154_v7 }
  0x2d   :  { %994 = vmatpush.bf16.msra.mxu1 %v1164_v9  ;;  %1183 = vmatpush.bf16.msra.mxu3 %v1164_v9 }
  0x2f   :  { %168 = vmatmul.bf16.vlgmr.msra.gmra.mxu0 %v84_v12  ;;  %188 = vmatmul.bf16.vlgmr.msra.gmra.mxu2 %v88_v13 }
  0x31   :  { %995 = vmatpush.bf16.msra.mxu1 %v1163_v20  ;;  %1184 = vmatpush.bf16.msra.mxu3 %v1163_v20 }
  0x3f   :  { %173 = vmatmul.bf16.gmra.mxu0 %v85_v18  ;;  %193 = vmatmul.bf16.gmra.mxu2 %v89_v19 }
  0x4f   :  { %178 = vmatmul.bf16.gmra.mxu0 %v86_v24  ;;  %198 = vmatmul.bf16.gmra.mxu2 %v90_v25 }
  0x5f   :  { %183 = vmatmul.bf16.gmra.mxu0 %v87_v30  ;;  %203 = vmatmul.bf16.gmra.mxu2 %v91_v31  ;;  %v1162_v30 = vld [vmem:[#allocation7] sm:$0xff] }
  0x60   :  { %996 = vmatpush.bf16.msra.mxu1 %v1162_v30  ;;  %1185 = vmatpush.bf16.msra.mxu3 %v1162_v30 }
  0xac   :  { %v169_v33 = vpop.f32.mrf.mxu0 }
  0xad   :  { %v1386_v34 = vadd.f32 %v1383_v32, %v169_v33 }
  0xaf   :  { %v1389_v36 = vmul.f32 0.70710677, %v1386_v34 }
  0xb1   :  { %v241_v37 = vmul.f32 %v1389_v36, %v1389_v36 }
  0xb2   :  { %v189_v39 = vpop.f32.mrf.mxu2 }
  0xb3   :  { %v1393_v40 = vmin.f32 %v241_v37, 16.0  ;;  %v1396_v41 = vadd.f32 %v1383_v32, %v189_v39 }
  0xb4   :  { %v171_v42 = vpop.f32.mrf.mxu0 }
  0xb5   :  { %v243_v43 = vmul.f32 2.1237322e-06, %v1393_v40  ;;  %v1400_v44 = vmul.f32 0.70710677, %v1396_v41  ;;  %v1403_v45 = vadd.f32 %v1383_v32, %v171_v42  ;;  %v254_v52 = vmul.f32 3.8918573e-05, %v1393_v40 }
  0xb7   :  { %v561_v47 = vmul.f32 %v1400_v44, %v1400_v44  ;;  %v1408_v48 = vmul.f32 0.70710677, %v1403_v45  ;;  %v244_v49 = vadd.f32 0.00028619796, %v243_v43  ;;  %v255_v61 = vadd.f32 0.001143296, %v254_v52 }
  0xb8   :  { %v1477_v52 = vmul.f32 0.5, %v1386_v34  ;;  %v1490_v0 = vmul.f32 0.5, %v1403_v45 }
  0xb9   :  { %v1410_v50 = vmin.f32 %v561_v47, 16.0  ;;  %v281_v51 = vmul.f32 %v1408_v48, %v1408_v48  ;;  %v245_v57 = vmul.f32 %v244_v49, %v1393_v40  ;;  %v256_v5 = vmul.f32 %v255_v61, %v1393_v40 }
  0xba   :  { %v191_v53 = vpop.f32.mrf.mxu2 }
  0xbb   :  { %v1415_v55 = vmin.f32 %v281_v51, 16.0  ;;  %v1418_v56 = vadd.f32 %v1383_v32, %v191_v53  ;;  %v563_v58 = vmul.f32 2.1237322e-06, %v1410_v50  ;;  %v246_v1 = vadd.f32 0.0036580483, %v245_v57 }
  0xbc   :  { %v174_v59 = vpop.f32.mrf.mxu0  ;;  %v257_v15 = vadd.f32 0.014752088, %v256_v5  ;;  %v1480_v53 = vmul.f32 0.5, %v1396_v41 }
  0xbd   :  { %v283_v60 = vmul.f32 2.1237322e-06, %v1415_v55  ;;  %v1424_v62 = vmul.f32 0.70710677, %v1418_v56  ;;  %v1427_v63 = vadd.f32 %v1383_v32, %v174_v59  ;;  %v564_v2 = vadd.f32 0.00028619796, %v563_v58 }
  0xbe   :  { %v247_v11 = vmul.f32 %v246_v1, %v1393_v40  ;;  %v258_v26 = vmul.f32 %v257_v15, %v1393_v40 }
  0xbf   :  { %v1430_v3 = vmul.f32 0.70710677, %v1427_v63  ;;  %v284_v4 = vadd.f32 0.00028619796, %v283_v60  ;;  %v601_v6 = vmul.f32 %v1424_v62, %v1424_v62  ;;  %v565_v12 = vmul.f32 %v564_v2, %v1410_v50 }
  0xc0   :  { %v248_v21 = vadd.f32 0.05243302, %v247_v11  ;;  %v259_v46 = vadd.f32 0.112945676, %v258_v26  ;;  %v1497_v2 = vmul.f32 0.5, %v1418_v56 }
  0xc1   :  { %v321_v7 = vmul.f32 %v1430_v3, %v1430_v3  ;;  %v285_v14 = vmul.f32 %v284_v4, %v1415_v55  ;;  %v1443_v16 = vmin.f32 %v601_v6, 16.0  ;;  %v566_v22 = vadd.f32 0.0036580483, %v565_v12 }
  0xc2   :  { %v194_v8 = vpop.f32.mrf.mxu2  ;;  %v249_v37 = vmul.f32 %v248_v21, %v1393_v40  ;;  %v260_v41 = vmul.f32 %v259_v46, %v1393_v40 }
  0xc3   :  { %v1438_v10 = vadd.f32 %v1383_v32, %v194_v8  ;;  %v1445_v17 = vmin.f32 %v321_v7, 16.0  ;;  %v286_v24 = vadd.f32 0.0036580483, %v285_v14  ;;  %v603_v27 = vmul.f32 2.1237322e-06, %v1443_v16 }
  0xc4   :  { %v176_v13 = vpop.f32.mrf.mxu0  ;;  %v567_v38 = vmul.f32 %v566_v22, %v1410_v50  ;;  %v250_v58 = vadd.f32 0.18741608, %v249_v37  ;;  %v1504_v8 = vmul.f32 0.5, %v1427_v63  ;;  %v261_v22 = vadd.f32 0.4994258, %v260_v41 }
  0xc5   :  { %v1448_v18 = vmul.f32 0.70710677, %v1438_v10  ;;  %v1451_v19 = vadd.f32 %v1383_v32, %v176_v13  ;;  %v323_v28 = vmul.f32 2.1237322e-06, %v1445_v17  ;;  %v287_v42 = vmul.f32 %v286_v24, %v1415_v55 }
  0xc6   :  { %v604_v47 = vadd.f32 0.00028619796, %v603_v27  ;;  %v568_v59 = vadd.f32 0.05243302, %v567_v38  ;;  %v251_v56 = vmul.f32 %v250_v58, %v1393_v40  ;;  %v1528_v38 = vmul.f32 0.5, %v1438_v10 }
  0xc7   :  { %v641_v23 = vmul.f32 %v1448_v18, %v1448_v18  ;;  %v1456_v25 = vmul.f32 0.70710677, %v1451_v19  ;;  %v324_v49 = vadd.f32 0.00028619796, %v323_v28  ;;  %v288_v34 = vadd.f32 0.05243302, %v287_v42 }
  0xc8   :  { %v605_v4 = vmul.f32 %v604_v47, %v1443_v16  ;;  %v569_v12 = vmul.f32 %v568_v59, %v1410_v50  ;;  %2066 = vst [vmem:[#allocation12_spill] sm:$0xff] %v1528_v38 }
  0xc9   :  { %v1461_v31 = vmin.f32 %v641_v23, 16.0  ;;  %v361_v33 = vmul.f32 %v1456_v25, %v1456_v25  ;;  %v325_v5 = vmul.f32 %v324_v49, %v1445_v17  ;;  %v289_v20 = vmul.f32 %v288_v34, %v1415_v55 }
  0xca   :  { %v196_v29 = vpop.f32.mrf.mxu2  ;;  %v606_v23 = vadd.f32 0.0036580483, %v605_v4  ;;  %v570_v37 = vadd.f32 0.18741608, %v569_v12 }
  0xcb   :  { %v1466_v35 = vadd.f32 %v1383_v32, %v196_v29  ;;  %v1471_v43 = vmin.f32 %v361_v33, 16.0  ;;  %v643_v54 = vmul.f32 2.1237322e-06, %v1461_v31  ;;  %v326_v24 = vadd.f32 0.0036580483, %v325_v5 }
  0xcc   :  { %v179_v39 = vpop.f32.mrf.mxu0  ;;  %v252_v33 = vadd.f32 1.1283791, %v251_v56  ;;  %v290_v42 = vadd.f32 0.18741608, %v289_v20  ;;  %v571_v5 = vmul.f32 %v570_v37, %v1410_v50 }
  0xcd   :  { %v1474_v51 = vmul.f32 0.70710677, %v1466_v35  ;;  %v1484_v57 = vadd.f32 %v1383_v32, %v179_v39  ;;  %v363_v60 = vmul.f32 2.1237322e-06, %v1471_v43  ;;  %v644_v45 = vadd.f32 0.00028619796, %v643_v54 }
  0xce   :  { %v607_v54 = vmul.f32 %v606_v23, %v1443_v16  ;;  %v327_v58 = vmul.f32 %v326_v24, %v1445_v17  ;;  %v1566_v37 = vmul.f32 0.5, %v1466_v35 }
  0xcf   :  { %v681_v61 = vmul.f32 %v1474_v51, %v1474_v51  ;;  %v1493_v1 = vmul.f32 0.70710677, %v1484_v57  ;;  %v364_v13 = vadd.f32 0.00028619796, %v363_v60  ;;  %v645_v27 = vmul.f32 %v644_v45, %v1461_v31 }
  0xd0   :  { %2068 = vst [vmem:[#allocation14_spill] sm:$0xff] %v1566_v37 }
  0xd1   :  { %v1501_v6 = vmin.f32 %v681_v61, 16.0  ;;  %v401_v9 = vmul.f32 %v1493_v1, %v1493_v1  ;;  %v365_v39 = vmul.f32 %v364_v13, %v1471_v43  ;;  %v262_v61 = vmul.f32 %v261_v22, %v1393_v40 }
  0xd2   :  { %v199_v7 = vpop.f32.mrf.mxu2  ;;  %v646_v10 = vadd.f32 0.0036580483, %v645_v27  ;;  %v291_v40 = vmul.f32 %v290_v42, %v1415_v55 }
  0xd3   :  { %v1509_v11 = vadd.f32 %v1383_v32, %v199_v7  ;;  %v683_v14 = vmul.f32 2.1237322e-06, %v1501_v6  ;;  %v1515_v21 = vmin.f32 %v401_v9, 16.0  ;;  %v1547_v7 = vmul.f32 0.5, %v1451_v19 }
  0xd4   :  { %v181_v15 = vpop.f32.mrf.mxu0  ;;  %v366_v45 = vadd.f32 0.0036580483, %v365_v39  ;;  %v1557_v23 = vadd.f32 1.0, %v262_v61  ;;  %v328_v19 = vadd.f32 0.05243302, %v327_v58  ;;  %v647_v24 = vmul.f32 %v646_v10, %v1461_v31 }
  0xd5   :  { %v1518_v63 = vmul.f32 0.70710677, %v1509_v11  ;;  %v684_v26 = vadd.f32 0.00028619796, %v683_v14  ;;  %v403_v28 = vmul.f32 2.1237322e-06, %v1515_v21  ;;  %v1525_v30 = vadd.f32 %v1383_v32, %v181_v15 }
  0xd6   :  { %v608_v15 = vadd.f32 0.05243302, %v607_v54  ;;  %v292_v42 = vadd.f32 1.1283791, %v291_v40  ;;  %1196 = vrcp.f32 %v1557_v23  ;;  %vm269_vm1 = vweird.f32 %v1557_v23 }
  0xd7   :  { %v721_v29 = vmul.f32 %v1518_v63, %v1518_v63  ;;  %v685_v46 = vmul.f32 %v684_v26, %v1501_v6  ;;  %v404_v47 = vadd.f32 0.00028619796, %v403_v28  ;;  %v1537_v59 = vmul.f32 0.70710677, %v1525_v30 }
  0xd8   :  { %v572_v28 = vadd.f32 1.1283791, %v571_v5  ;;  %v609_v35 = vmul.f32 %v608_v15, %v1443_v16 }
  0xd9   :  { %v1532_v49 = vmin.f32 %v721_v29, 16.0  ;;  %v405_v34 = vmul.f32 %v404_v47, %v1515_v21  ;;  %v441_v9 = vmul.f32 %v1537_v59, %v1537_v59  ;;  %v686_v12 = vadd.f32 0.0036580483, %v685_v46 }
  0xda   :  { %v201_v60 = vpop.f32.mrf.mxu2  ;;  %v367_v29 = vmul.f32 %v366_v45, %v1471_v43 }
  0xdb   :  { %v723_v41 = vmul.f32 2.1237322e-06, %v1532_v49  ;;  %v1543_v4 = vadd.f32 %v1383_v32, %v201_v60  ;;  %v406_v13 = vadd.f32 0.0036580483, %v405_v34  ;;  %v1552_v20 = vmin.f32 %v441_v9, 16.0 }
  0xdc   :  { %v184_v56 = vpop.f32.mrf.mxu0  ;;  %v687_v46 = vmul.f32 %v686_v12, %v1501_v6  ;;  %v329_v34 = vmul.f32 %v328_v19, %v1445_v17  ;;  %v368_v45 = vadd.f32 0.05243302, %v367_v29 }
  0xdd   :  { %v724_v14 = vadd.f32 0.00028619796, %v723_v41  ;;  %v1555_v22 = vadd.f32 %v1383_v32, %v184_v56  ;;  %v1562_v27 = vmul.f32 0.70710677, %v1543_v4  ;;  %v443_v39 = vmul.f32 2.1237322e-06, %v1552_v20 }
  0xde   :  { %v407_v47 = vmul.f32 %v406_v13, %v1515_v21  ;;  %v648_v41 = vadd.f32 0.05243302, %v647_v24  ;;  %v1588_v13 = vmul.f32 %v252_v33, %v1389_v36  ;;  %v1603_v33 = vpop.eup %1196 }
  0xdf   :  { %2067 = vst [vmem:[#allocation13_spill] sm:$0xff] %v1555_v22  ;;  %v725_v26 = vmul.f32 %v724_v14, %v1532_v49  ;;  %v761_v54 = vmul.f32 %v1562_v27, %v1562_v27  ;;  %v444_v60 = vadd.f32 0.00028619796, %v443_v39  ;;  %v1574_v61 = vmul.f32 0.70710677, %v1555_v22 }
  0xe0   :  { %v688_v14 = vadd.f32 0.05243302, %v687_v46  ;;  %v408_v15 = vadd.f32 0.05243302, %v407_v47  ;;  %v330_v46 = vadd.f32 0.18741608, %v329_v34  ;;  %v649_v47 = vmul.f32 %v648_v41, %v1461_v31 }
  0xe1   :  { %v726_v58 = vadd.f32 0.0036580483, %v725_v26  ;;  %2069 = vst [vmem:[#allocation15_spill] sm:$0xff] %v1574_v61  ;;  %v1579_v5 = vmin.f32 %v761_v54, 16.0  ;;  %v445_v9 = vmul.f32 %v444_v60, %v1552_v20  ;;  %v481_v56 = vmul.f32 %v1574_v61, %v1574_v61 }
  0xe2   :  { %v204_v10 = vpop.f32.mrf.mxu2  ;;  %v1598_v54 = vmul.f32 %v572_v28, %v1400_v44  ;;  %v610_v60 = vadd.f32 0.18741608, %v609_v35  ;;  %v409_v35 = vmul.f32 %v408_v15, %v1515_v21  ;;  %vm270_vm0 = vweird.f32 %v1603_v33 }
  0xe3   :  { %v1585_v40 = vadd.f32 %v1383_v32, %v204_v10  ;;  %v763_v19 = vmul.f32 2.1237322e-06, %v1579_v5  ;;  %v727_v24 = vmul.f32 %v726_v58, %v1532_v49  ;;  %v446_v26 = vadd.f32 0.0036580483, %v445_v9  ;;  %vm1690_vm2 = vmor %vm269_vm1, %vm270_vm0 }
  0xe4   :  { %v186_v12 = vpop.f32.mrf.mxu0  ;;  %v1592_v29 = vmin.f32 %v481_v56, 16.0  ;;  %v369_v56 = vmul.f32 %v368_v45, %v1471_v43  ;;  %v265_v45 = vmul.f32 %v1603_v33, %v1557_v23  ;;  %v410_v38 = vadd.f32 0.18741608, %v409_v35 }
  0xe5   :  { %2070 = vst [vmem:[#allocation16_spill] sm:$0xff] %v1585_v40  ;;  %v1595_v39 = vadd.f32 %v1383_v32, %v186_v12  ;;  %v764_v10 = vadd.f32 0.00028619796, %v763_v19  ;;  %v1601_v36 = vmul.f32 0.70710677, %v1585_v40  ;;  %v447_v58 = vmul.f32 %v446_v26, %v1552_v20 }
  0xe6   :  { %v483_v9 = vmul.f32 2.1237322e-06, %v1592_v29  ;;  %v689_v12 = vmul.f32 %v688_v14, %v1501_v6  ;;  %v728_v19 = vadd.f32 0.05243302, %v727_v24  ;;  %v611_v14 = vmul.f32 %v610_v60, %v1443_v16 }
  0xe7   :  { %2071 = vst [vmem:[#allocation17_spill] sm:$0xff] %v1595_v39  ;;  %v765_v44 = vmul.f32 %v764_v10, %v1579_v5  ;;  %v801_v28 = vmul.f32 %v1601_v36, %v1601_v36  ;;  %v1615_v34 = vmul.f32 0.70710677, %v1595_v39  ;;  %v448_v41 = vadd.f32 0.05243302, %v447_v58 }
  0xe8   :  { %2072 = vst [vmem:[#allocation18_spill] sm:$0xff] %v1601_v36  ;;  %v484_v40 = vadd.f32 0.00028619796, %v483_v9  ;;  %v331_v10 = vmul.f32 %v330_v46, %v1445_v17  ;;  %v1627_v24 = vmul.f32 %v292_v42, %v1408_v48  ;;  %v650_v58 = vadd.f32 0.18741608, %v649_v47 }
  0xe9   :  { %2073 = vst [vmem:[#allocation19_spill] sm:$0xff] %v1615_v34  ;;  %v766_v26 = vadd.f32 0.0036580483, %v765_v44  ;;  %v1617_v22 = vmin.f32 %v801_v28, 16.0  ;;  %v521_v15 = vmul.f32 %v1615_v34, %v1615_v34  ;;  %v370_v28 = vadd.f32 0.18741608, %v369_v56 }
  0xea   :  { %v206_v37 = vpop.f32.mrf.mxu2  ;;  %v485_v36 = vmul.f32 %v484_v40, %v1592_v29  ;;  %v690_v39 = vadd.f32 0.18741608, %v689_v12  ;;  %v729_v46 = vmul.f32 %v728_v19, %v1532_v49  ;;  %v449_v40 = vmul.f32 %v448_v41, %v1552_v20 }
  0xeb   :  { %v767_v9 = vmul.f32 %v766_v26, %v1579_v5  ;;  %v803_v44 = vmul.f32 2.1237322e-06, %v1617_v22  ;;  %v1632_v60 = vadd.f32 %v1383_v32, %v206_v37  ;;  %v1636_v34 = vmin.f32 %v521_v15, 16.0 }
  0xec   :  { %v486_v61 = vadd.f32 0.0036580483, %v485_v36  ;;  %v612_v48 = vadd.f32 1.1283791, %v611_v14  ;;  %v332_v42 = vadd.f32 1.1283791, %v331_v10  ;;  %v651_v56 = vmul.f32 %v650_v58, %v1461_v31 }
  0xed   :  { %2074 = vst [vmem:[#allocation20_spill] sm:$0xff] %v1632_v60  ;;  %v1639_v47 = vmul.f32 0.5, %v1484_v57  ;;  %v266_v26 = vsub.f32 1.0, %v265_v45  ;;  %v1643_v12 = vmul.f32 0.5, %v1509_v11  ;;  %v768_v32 = vadd.f32 0.05243302, %v767_v9 }
  0xee   :  { %v804_v37 = vadd.f32 0.00028619796, %v803_v44  ;;  %v371_v35 = vmul.f32 %v370_v28, %v1471_v43  ;;  %v691_v19 = vmul.f32 %v690_v39, %v1501_v6  ;;  %v411_v36 = vmul.f32 %v410_v38, %v1515_v21 }
  0xef   :  { %2075 = vst [vmem:[#allocation21_spill] sm:$0xff] %v1643_v12  ;;  %v1649_v41 = vmul.f32 0.70710677, %v1632_v60  ;;  %v730_v14 = vadd.f32 0.18741608, %v729_v46  ;;  %v487_v45 = vmul.f32 %v486_v61, %v1592_v29  ;;  %v1654_v11 = vmul.f32 %v612_v48, %v1424_v62 }
  0xf0   :  { %v450_v57 = vadd.f32 0.18741608, %v449_v40  ;;  %v523_v10 = vmul.f32 2.1237322e-06, %v1636_v34  ;;  %v1657_v15 = vmul.f32 %v332_v42, %v1430_v3  ;;  %v1660_v58 = vmul.f32 0.5, %v1525_v30 }
  0xf1   :  { %2076 = vst [vmem:[#allocation22_spill] sm:$0xff] %v1649_v41  ;;  %v267_v38 = vmul.f32 %v1603_v33, %v266_v26  ;;  %v652_v39 = vadd.f32 1.1283791, %v651_v56  ;;  %v769_v9 = vmul.f32 %v768_v32, %v1579_v5  ;;  %v805_v44 = vmul.f32 %v804_v37, %v1617_v22 }
  0xf2   :  { %2077 = vst [vmem:[#allocation23_spill] sm:$0xff] %v1660_v58  ;;  %v294_v61 = vmul.f32 3.8918573e-05, %v1415_v55  ;;  %v372_v28 = vadd.f32 1.1283791, %v371_v35  ;;  %v841_v62 = vmul.f32 %v1649_v41, %v1649_v41  ;;  %v731_v3 = vmul.f32 %v730_v14, %v1532_v49 }
  0xf3   :  { %v692_v46 = vadd.f32 1.1283791, %v691_v19  ;;  %v1666_v40 = vadd.f32 1.1283791, %v411_v36  ;;  %v451_v30 = vmul.f32 %v450_v57, %v1552_v20  ;;  %v488_v48 = vadd.f32 0.05243302, %v487_v45 }
  0xf4   :  { %v524_v42 = vadd.f32 0.00028619796, %v523_v10  ;;  %v268_v26 = vadd.f32 %v1603_v33, %v267_v38  ;;  %v273_v56 = vand.u32 2147483647, %v1557_v23  ;;  %v295_v32 = vadd.f32 0.001143296, %v294_v61 }
  0xf5   :  { %v1676_v37 = vmul.f32 0.5, %v1543_v4  ;;  %v770_v35 = vadd.f32 0.18741608, %v769_v9  ;;  %v806_v19 = vadd.f32 0.0036580483, %v805_v44  ;;  %v275_v36 = vand.u32 2147483648, %v1557_v23 }
  0xf6   :  { %v1679_v60 = vmin.f32 %v841_v62, 16.0  ;;  %v296_v14 = vmul.f32 %v295_v32, %v1415_v55  ;;  %v574_v57 = vmul.f32 3.8918573e-05, %v1410_v50  ;;  %v732_v45 = vadd.f32 1.1283791, %v731_v3 }
  0xf7   :  { %2078 = vst [vmem:[#allocation24_spill] sm:$0xff] %v1676_v37  ;;  %v1684_v10 = vadd.f32 1.1283791, %v451_v30  ;;  %v489_v38 = vmul.f32 %v488_v48, %v1592_v29  ;;  %v525_v4 = vmul.f32 %v524_v42, %v1636_v34  ;;  %v272_v23 = vsel %vm1690_vm2, %v1603_v33, %v268_v26 }
  0xf8   :  { %vm274_vm3 = vcmp.eq.f32.partialorder %v273_v56, 8.507059e+37  ;;  %v297_v44 = vadd.f32 0.014752088, %v296_v14  ;;  %v575_v61 = vadd.f32 0.001143296, %v574_v57  ;;  %v771_v62 = vmul.f32 %v770_v35, %v1579_v5 }
  0xf9   :  { %v807_v3 = vmul.f32 %v806_v19, %v1617_v22  ;;  %v276_v30 = vor.u32 1.1754944e-38, %v275_v36  ;;  %v614_v48 = vmul.f32 3.8918573e-05, %v1443_v16  ;;  %v843_v42 = vmul.f32 2.1237322e-06, %v1679_v60 }
  0xfa   :  { %v298_v32 = vmul.f32 %v297_v44, %v1415_v55  ;;  %v576_v41 = vmul.f32 %v575_v61, %v1410_v50  ;;  %v334_v37 = vmul.f32 3.8918573e-05, %v1445_v17  ;;  %v490_v9 = vadd.f32 0.18741608, %v489_v38 }
  0xfb   :  { %v526_v33 = vadd.f32 0.0036580483, %v525_v4  ;;  %v277_v26 = vsel %vm274_vm3, %v276_v30, %v272_v23  ;;  %v615_v56 = vadd.f32 0.001143296, %v614_v48  ;;  %v1705_v14 = vmul.f32 %v652_v39, %v1448_v18 }
  0xfc   :  { %v299_v35 = vadd.f32 0.112945676, %v298_v32  ;;  %v577_v19 = vadd.f32 0.014752088, %v576_v41  ;;  %v335_v36 = vadd.f32 0.001143296, %v334_v37  ;;  %v278_v58 = vmul.f32 %v277_v26, %v1588_v13 }
  0xfd   :  { %v1707_v57 = vadd.f32 1.1283791, %v771_v62  ;;  %v1709_v12 = vadd.f32 0.05243302, %v807_v3  ;;  %v616_v44 = vmul.f32 %v615_v56, %v1443_v16  ;;  %v374_v61 = vmul.f32 3.8918573e-05, %v1471_v43 }
  0xfe   :  { %v300_v38 = vmul.f32 %v299_v35, %v1415_v55  ;;  %v578_v4 = vmul.f32 %v577_v19, %v1410_v50  ;;  %v336_v18 = vmul.f32 %v335_v36, %v1445_v17  ;;  %v1718_v39 = vmul.f32 %v372_v28, %v1456_v25 }
  0xff   :  { %2081 = vst [vmem:[#allocation25_spill] sm:$0xff] %v1709_v12  ;;  %v844_v41 = vadd.f32 0.00028619796, %v843_v42  ;;  %v617_v37 = vadd.f32 0.014752088, %v616_v44  ;;  %v1721_v62 = vmul.f32 %v692_v46, %v1474_v51  ;;  %v527_v13 = vmul.f32 %v526_v33, %v1636_v34 }
 0x100   :  { %v375_v23 = vadd.f32 0.001143296, %v374_v61  ;;  %v301_v3 = vadd.f32 0.4994258, %v300_v38  ;;  %v579_v30 = vadd.f32 0.112945676, %v578_v4  ;;  %v1732_v51 = vmul.f32 %v1666_v40, %v1493_v1 }
 0x101   :  { %v337_v48 = vadd.f32 0.014752088, %v336_v18  ;;  %v618_v32 = vmul.f32 %v617_v37, %v1443_v16  ;;  %v654_v56 = vmul.f32 3.8918573e-05, %v1461_v31  ;;  %v1106_v35 = vclamps-f32 %v278_v58, 1.0 }
 0x102   :  { %v376_v26 = vmul.f32 %v375_v23, %v1471_v43  ;;  %v302_v25 = vmul.f32 %v301_v3, %v1415_v55  ;;  %v580_v28 = vmul.f32 %v579_v30, %v1410_v50  ;;  %v694_v33 = vmul.f32 3.8918573e-05, %v1501_v6 }
 0x103   :  { %v338_v42 = vmul.f32 %v337_v48, %v1445_v17  ;;  %v619_v46 = vadd.f32 0.112945676, %v618_v32  ;;  %v1736_v36 = vmul.f32 %v732_v45, %v1518_v63  ;;  %v491_v55 = vmul.f32 %v490_v9, %v1592_v29 }
 0x104   :  { %v377_v19 = vadd.f32 0.014752088, %v376_v26  ;;  %v1738_v44 = vadd.f32 1.0, %v302_v25  ;;  %v581_v58 = vadd.f32 0.4994258, %v580_v28  ;;  %v845_v40 = vmul.f32 %v844_v41, %v1679_v60 }
 0x105   :  { %v339_v61 = vadd.f32 0.112945676, %v338_v42  ;;  %v620_v38 = vmul.f32 %v619_v46, %v1443_v16  ;;  %v655_v18 = vadd.f32 0.001143296, %v654_v56  ;;  %v528_v1 = vadd.f32 0.05243302, %v527_v13 }
 0x106   :  { %v378_v4 = vmul.f32 %v377_v19, %v1471_v43  ;;  %1198 = vrcp.f32 %v1738_v44  ;;  %v881_v37 = vadd.f32 1.0, %v1106_v35  ;;  %v582_v63 = vmul.f32 %v581_v58, %v1410_v50 }
 0x107   :  { %v621_v45 = vadd.f32 0.4994258, %v620_v38  ;;  %v340_v23 = vmul.f32 %v339_v61, %v1445_v17  ;;  %v313_v30 = vand.u32 2147483647, %v1738_v44  ;;  %v315_v9 = vand.u32 2147483648, %v1738_v44 }
 0x108   :  { %v379_v3 = vadd.f32 0.112945676, %v378_v4  ;;  %v656_v48 = vmul.f32 %v655_v18, %v1461_v31  ;;  %v695_v32 = vadd.f32 0.001143296, %v694_v33  ;;  %v1750_v26 = vadd.f32 1.0, %v582_v63 }
 0x109   :  { %v622_v41 = vmul.f32 %v621_v45, %v1443_v16  ;;  %v341_v13 = vadd.f32 0.4994258, %v340_v23  ;;  %v1756_v50 = vmul.f32 %v1684_v10, %v1537_v59  ;;  %v1758_v35 = vadd.f32 1.1283791, %v491_v55 }
 0x10a   :  { %v380_v56 = vmul.f32 %v379_v3, %v1471_v43  ;;  %v1760_v25 = vadd.f32 0.0036580483, %v845_v40  ;;  %v657_v28 = vadd.f32 0.014752088, %v656_v48  ;;  %v1763_v42 = vmul.f32 %v528_v1, %v1636_v34 }
 0x10b   :  { %v1766_v46 = vmul.f32 %v881_v37, %v1477_v52  ;;  %1200 = vrcp.f32 %v1750_v26  ;;  %v696_v16 = vmul.f32 %v695_v32, %v1501_v6  ;;  %v1770_v33 = vadd.f32 1.0, %v622_v41 }
 0x10c   :  { %v1199_v19 = vpop.eup %1198  ;;  %v342_v59 = vmul.f32 %v341_v13, %v1445_v17  ;;  %v381_v10 = vadd.f32 0.4994258, %v380_v56  ;;  %v658_v58 = vmul.f32 %v657_v28, %v1461_v31  ;;  %vm309_vm4 = vweird.f32 %v1738_v44 }
 0x10d   :  { %v305_v61 = vmul.f32 %v1199_v19, %v1738_v44  ;;  %vm1776_vm5 = vcmp.eq.f32.partialorder %v313_v30, 8.507059e+37  ;;  %v316_v52 = vor.u32 1.1754944e-38, %v315_v9  ;;  %v593_v38 = vand.u32 2147483647, %v1750_v26 }
 0x10e   :  { %v595_v4 = vand.u32 2147483648, %v1750_v26  ;;  %1202 = vrcp.f32 %v1770_v33  ;;  %v414_v17 = vmul.f32 3.8918573e-05, %v1515_v21  ;;  %v1784_v1 = vadd.f32 1.0, %v342_v59 }
 0x10f   :  { %v306_v18 = vsub.f32 1.0, %v305_v61  ;;  %v382_v40 = vmul.f32 %v381_v10, %v1471_v43  ;;  %v659_v37 = vadd.f32 0.112945676, %v658_v58  ;;  %vm310_vm6 = vweird.f32 %v1199_v19 }
 0x110   :  { %vm589_vm7 = vweird.f32 %v1750_v26  ;;  %v697_v63 = vadd.f32 0.014752088, %v696_v16  ;;  %v1789_v45 = vmul.f32 3.8918573e-05, %v1552_v20  ;;  %v633_v30 = vand.u32 2147483647, %v1770_v33  ;;  %vm311_vm10 = vmor %vm309_vm4, %vm310_vm6 }
 0x111   :  { %v1201_v23 = vpop.eup %1200  ;;  %v307_v3 = vmul.f32 %v1199_v19, %v306_v18  ;;  %v635_v9 = vand.u32 2147483648, %v1770_v33  ;;  %1204 = vrcp.f32 %v1784_v1  ;;  %vm1795_vm8 = vcmp.eq.f32.partialorder %v593_v38, 8.507059e+37 }
 0x112   :  { %v585_v48 = vmul.f32 %v1201_v23, %v1750_v26  ;;  %v596_v32 = vor.u32 1.1754944e-38, %v595_v4  ;;  %v1799_v41 = vadd.f32 1.0, %v382_v40  ;;  %vm629_vm9 = vweird.f32 %v1770_v33 }
 0x113   :  { %v308_v13 = vadd.f32 %v1199_v19, %v307_v3  ;;  %v660_v56 = vmul.f32 %v659_v37, %v1461_v31  ;;  %v698_v28 = vmul.f32 %v697_v63, %v1501_v6  ;;  %v353_v10 = vand.u32 2147483647, %v1784_v1 }
 0x114   :  { %v1203_v16 = vpop.eup %1202  ;;  %v586_v59 = vsub.f32 1.0, %v585_v48  ;;  %v355_v58 = vand.u32 2147483648, %v1784_v1  ;;  %1206 = vrcp.f32 %v1799_v41  ;;  %vm1811_vm11 = vcmp.eq.f32.partialorder %v633_v30, 8.507059e+37 }
 0x115   :  { %v312_v61 = vsel %vm311_vm10, %v1199_v19, %v308_v13  ;;  %v625_v38 = vmul.f32 %v1203_v16, %v1770_v33  ;;  %v636_v18 = vor.u32 1.1754944e-38, %v635_v9  ;;  %v415_v40 = vadd.f32 0.001143296, %v414_v17 }
 0x116   :  { %v317_v44 = vsel %vm1776_vm5, %v316_v52, %v312_v61  ;;  %v587_v37 = vmul.f32 %v1201_v23, %v586_v59  ;;  %vm590_vm12 = vweird.f32 %v1201_v23  ;;  %vm349_vm13 = vweird.f32 %v1784_v1 }
 0x117   :  { %v661_v63 = vadd.f32 0.4994258, %v660_v56  ;;  %v1205_v3 = vpop.eup %1204  ;;  %v318_v48 = vmul.f32 %v317_v44, %v1627_v24  ;;  %v626_v19 = vsub.f32 1.0, %v625_v38  ;;  %v393_v13 = vand.u32 2147483647, %v1799_v41  ;;  %vm591_vm0 = vmor %vm589_vm7, %vm590_vm12 }
 0x118   :  { %v699_v30 = vadd.f32 0.112945676, %v698_v28  ;;  %v588_v12 = vadd.f32 %v1201_v23, %v587_v37  ;;  %vm630_vm14 = vweird.f32 %v1203_v16  ;;  %v345_v9 = vmul.f32 %v1205_v3, %v1784_v1 }
 0x119   :  { %vm1821_vm15 = vcmp.eq.f32.partialorder %v353_v10, 8.507059e+37  ;;  %v356_v55 = vor.u32 1.1754944e-38, %v355_v58  ;;  %v1107_v52 = vclamps-f32 %v318_v48, 1.0  ;;  %v627_v56 = vmul.f32 %v1203_v16, %v626_v19  ;;  %vm631_vm3 = vmor %vm629_vm9, %vm630_vm14 }
 0x11a   :  { %v662_v24 = vmul.f32 %v661_v63, %v1461_v31  ;;  %v700_v59 = vmul.f32 %v699_v30, %v1501_v6  ;;  %v1207_v61 = vpop.eup %1206  ;;  %v592_v28 = vsel %vm591_vm0, %v1201_v23, %v588_v12  ;;  %v346_v38 = vsub.f32 1.0, %v345_v9 }
 0x11b   :  { %vm389_vm1 = vweird.f32 %v1799_v41  ;;  %v395_v10 = vand.u32 2147483648, %v1799_v41  ;;  %v882_v44 = vadd.f32 1.0, %v1107_v52  ;;  %v597_v58 = vsel %vm1795_vm8, %v596_v32, %v592_v28 }
 0x11c   :  { %v628_v37 = vadd.f32 %v1203_v16, %v627_v56  ;;  %v385_v26 = vmul.f32 %v1207_v61, %v1799_v41  ;;  %vm1834_vm2 = vcmp.eq.f32.partialorder %v393_v13, 8.507059e+37  ;;  %v598_v31 = vmul.f32 %v597_v58, %v1598_v54 }
 0x11d   :  { %v347_v12 = vmul.f32 %v1205_v3, %v346_v38  ;;  %vm350_vm4 = vweird.f32 %v1205_v3  ;;  %v1842_v23 = vadd.f32 1.0, %v662_v24  ;;  %v898_v43 = vmul.f32 %v882_v44, %v1490_v0 }
 0x11e   :  { %v632_v32 = vsel %vm631_vm3, %v1203_v16, %v628_v37  ;;  %v386_v63 = vsub.f32 1.0, %v385_v26  ;;  %v701_v19 = vadd.f32 0.4994258, %v700_v59  ;;  %v1114_v30 = vclamps-f32 %v598_v31, 1.0  ;;  %vm351_vm5 = vmor %vm349_vm13, %vm350_vm4 }
 0x11f   :  { %v637_v13 = vsel %vm1811_vm11, %v636_v18, %v632_v32  ;;  %v348_v9 = vadd.f32 %v1205_v3, %v347_v12  ;;  %1208 = vrcp.f32 %v1842_v23  ;;  %v913_v54 = vpack.c.bf16 %v898_v43, %v1766_v46 }
 0x120   :  { %v638_v33 = vmul.f32 %v637_v13, %v1654_v11  ;;  %v387_v52 = vmul.f32 %v1207_v61, %v386_v63  ;;  %vm390_vm6 = vweird.f32 %v1207_v61  ;;  %v889_v0 = vadd.f32 1.0, %v1114_v30 }
 0x121   :  { %v352_v16 = vsel %vm351_vm5, %v1205_v3, %v348_v9  ;;  %v416_v56 = vmul.f32 %v415_v40, %v1515_v21  ;;  %v455_v24 = vadd.f32 0.001143296, %v1789_v45  ;;  %997 = vmatmul.bf16.vlgmr.msra.gmra.mxu1 %v913_v54  ;;  %v702_v46 = vmul.f32 %v701_v19, %v1501_v6  ;;  %vm391_vm7 = vmor %vm389_vm1, %vm390_vm6 }
 0x122   :  { %v1115_v4 = vclamps-f32 %v638_v33, 1.0  ;;  %v357_v18 = vsel %vm1821_vm15, %v356_v55, %v352_v16  ;;  %v388_v59 = vadd.f32 %v1207_v61, %v387_v52  ;;  %v396_v1 = vor.u32 1.1754944e-38, %v395_v10 }
 0x123   :  { %v358_v11 = vmul.f32 %v357_v18, %v1657_v15  ;;  %v673_v3 = vand.u32 2147483647, %v1842_v23  ;;  %v675_v40 = vand.u32 2147483648, %v1842_v23  ;;  %v905_v45 = vmul.f32 %v889_v0, %v1480_v53 }
 0x124   :  { %v890_v28 = vadd.f32 1.0, %v1115_v4  ;;  %v392_v38 = vsel %vm391_vm7, %v1207_v61, %v388_v59  ;;  %v1863_v44 = vadd.f32 1.0, %v702_v46  ;;  %v417_v15 = vadd.f32 0.014752088, %v416_v56 }
 0x125   :  { %v1209_v17 = vpop.eup %1208  ;;  %v1108_v55 = vclamps-f32 %v358_v11, 1.0  ;;  %v397_v6 = vsel %vm1834_vm2, %v396_v1, %v392_v38  ;;  %v456_v41 = vmul.f32 %v455_v24, %v1552_v20  ;;  %v734_v26 = vmul.f32 3.8918573e-05, %v1532_v49 }
 0x126   :  { %v906_v10 = vmul.f32 %v890_v28, %v1497_v2  ;;  %v398_v58 = vmul.f32 %v397_v6, %v1718_v39  ;;  %v665_v37 = vmul.f32 %v1209_v17, %v1842_v23  ;;  %vm669_vm8 = vweird.f32 %v1842_v23 }
 0x127   :  { %vm1873_vm9 = vcmp.eq.f32.partialorder %v673_v3, 8.507059e+37  ;;  %v676_v61 = vor.u32 1.1754944e-38, %v675_v40  ;;  %1210 = vrcp.f32 %v1863_v44  ;;  %v883_v12 = vadd.f32 1.0, %v1108_v55 }
 0x128   :  { %v917_v48 = vpack.c.bf16 %v906_v10, %v905_v45  ;;  %v1109_v31 = vclamps-f32 %v398_v58, 1.0  ;;  %v666_v43 = vsub.f32 1.0, %v665_v37  ;;  %vm670_vm10 = vweird.f32 %v1209_v17 }
 0x129   :  { %v713_v2 = vand.u32 2147483647, %v1863_v44  ;;  %v418_v39 = vmul.f32 %v417_v15, %v1515_v21  ;;  %v457_v32 = vadd.f32 0.014752088, %v456_v41  ;;  %v715_v30 = vand.u32 2147483648, %v1863_v44  ;;  %vm671_vm11 = vmor %vm669_vm8, %vm670_vm10 }
 0x12a   :  { %1017 = vmatmul.bf16.vlgmr.msra.gmra.mxu3 %v917_v48  ;;  %v884_v63 = vadd.f32 1.0, %v1109_v31  ;;  %v667_v19 = vmul.f32 %v1209_v17, %v666_v43  ;;  %v735_v13 = vadd.f32 0.001143296, %v734_v26  ;;  %v774_v33 = vmul.f32 3.8918573e-05, %v1579_v5 }
 0x12b   :  { %v419_v9 = vadd.f32 0.112945676, %v418_v39  ;;  %v458_v54 = vmul.f32 %v457_v32, %v1552_v20  ;;  %v494_v52 = vmul.f32 3.8918573e-05, %v1592_v29  ;;  %v899_v0 = vmul.f32 %v883_v12, %v1504_v8 }
 0x12c   :  { %v900_v16 = vmul.f32 %v884_v63, %v1547_v7  ;;  %v668_v56 = vadd.f32 %v1209_v17, %v667_v19  ;;  %v736_v24 = vmul.f32 %v735_v13, %v1532_v49  ;;  %v775_v46 = vadd.f32 0.001143296, %v774_v33 }
 0x12d   :  { %v1211_v4 = vpop.eup %1210  ;;  %v420_v18 = vmul.f32 %v419_v9, %v1515_v21  ;;  %v459_v59 = vadd.f32 0.112945676, %v458_v54  ;;  %v495_v11 = vadd.f32 0.001143296, %v494_v52  ;;  %v534_v8 = vmul.f32 3.8918573e-05, %v1636_v34 }
 0x12e   :  { %v914_v1 = vpack.c.bf16 %v900_v16, %v899_v0  ;;  %v672_v3 = vsel %vm671_vm11, %v1209_v17, %v668_v56  ;;  %v705_v40 = vmul.f32 %v1211_v4, %v1863_v44  ;;  %v737_v38 = vadd.f32 0.014752088, %v736_v24 }
 0x12f   :  { %v677_v7 = vsel %vm1873_vm9, %v676_v61, %v672_v3  ;;  %v421_v28 = vadd.f32 0.4994258, %v420_v18  ;;  %v460_v45 = vmul.f32 %v459_v59, %v1552_v20  ;;  %vm710_vm12 = vweird.f32 %v1211_v4 }
 0x130   :  { %v706_v23 = vsub.f32 1.0, %v705_v40  ;;  %v776_v55 = vmul.f32 %v775_v46, %v1579_v5  ;;  %v496_v6 = vmul.f32 %v495_v11, %v1592_v29  ;;  %v678_v15 = vmul.f32 %v677_v7, %v1705_v14  ;;  %v2095_v40 = vld [vmem:[#allocation12_spill] sm:$0xff] }
 0x131   :  { %v422_v17 = vmul.f32 %v421_v28, %v1515_v21  ;;  %v461_v41 = vadd.f32 0.4994258, %v460_v45  ;;  %v738_v10 = vmul.f32 %v737_v38, %v1532_v49  ;;  %1002 = vmatmul.bf16.gmra.mxu1 %v914_v1  ;;  %v535_v53 = vadd.f32 0.001143296, %v534_v8 }
 0x132   :  { %v707_v58 = vmul.f32 %v1211_v4, %v706_v23  ;;  %v777_v37 = vadd.f32 0.014752088, %v776_v55  ;;  %v497_v26 = vadd.f32 0.014752088, %v496_v6  ;;  %v530_v61 = vadd.f32 0.18741608, %v1763_v42 }
 0x133   :  { %v1902_v48 = vadd.f32 1.0, %v422_v17  ;;  %v462_v31 = vmul.f32 %v461_v41, %v1552_v20  ;;  %v739_v12 = vadd.f32 0.112945676, %v738_v10  ;;  %vm709_vm13 = vweird.f32 %v1863_v44  ;;  %v2096_v23 = vld [vmem:[#allocation14_spill] sm:$0xff] }
 0x134   :  { %v708_v43 = vadd.f32 %v1211_v4, %v707_v58  ;;  %vm714_vm14 = vcmp.eq.f32.partialorder %v713_v2, 8.507059e+37  ;;  %v778_v21 = vmul.f32 %v777_v37, %v1579_v5  ;;  %v1116_v14 = vclamps-f32 %v678_v15, 1.0  ;;  %vm711_vm15 = vmor %vm709_vm13, %vm710_vm12  ;;  %v2094_v2 = vld [vmem:[#allocation15_spill] sm:$0xff] }
 0x135   :  { %v716_v39 = vor.u32 1.1754944e-38, %v715_v30  ;;  %1212 = vrcp.f32 %v1902_v48  ;;  %v498_v32 = vmul.f32 %v497_v26, %v1592_v29  ;;  %v1910_v63 = vadd.f32 1.0, %v462_v31 }
 0x136   :  { %v712_v42 = vsel %vm711_vm15, %v1211_v4, %v708_v43  ;;  %v740_v20 = vmul.f32 %v739_v12, %v1532_v49  ;;  %v536_v19 = vmul.f32 %v535_v53, %v1636_v34  ;;  %v1916_v44 = vmul.f32 %v1707_v57, %v1562_v27 }
 0x137   :  { %v1920_v13 = vmul.f32 %v1758_v35, %v2094_v2  ;;  %v717_v30 = vsel %vm714_vm14, %v716_v39, %v712_v42  ;;  %v779_v9 = vadd.f32 0.112945676, %v778_v21  ;;  %v1923_v54 = vmul.f32 %v530_v61, %v1636_v34 }
 0x138   :  { %v1927_v33 = vmul.f32 %v1760_v25, %v1679_v60  ;;  %v718_v52 = vmul.f32 %v717_v30, %v1721_v62  ;;  %1214 = vrcp.f32 %v1910_v63  ;;  %v891_v0 = vadd.f32 1.0, %v1116_v14 }
 0x139   :  { %v741_v27 = vadd.f32 0.4994258, %v740_v20  ;;  %v780_v57 = vmul.f32 %v779_v9, %v1579_v5  ;;  %v499_v16 = vadd.f32 0.112945676, %v498_v32  ;;  %vm429_vm0 = vweird.f32 %v1902_v48 }
 0x13a   :  { %v1117_v35 = vclamps-f32 %v718_v52, 1.0  ;;  %v537_v56 = vadd.f32 0.014752088, %v536_v19  ;;  %v814_v24 = vmul.f32 3.8918573e-05, %v1617_v22  ;;  %v435_v1 = vand.u32 2147483648, %v1902_v48 }
 0x13b   :  { %v1213_v4 = vpop.eup %1212  ;;  %v433_v18 = vand.u32 2147483647, %v1902_v48  ;;  %v742_v25 = vmul.f32 %v741_v27, %v1532_v49  ;;  %v781_v59 = vadd.f32 0.4994258, %v780_v57  ;;  %v500_v62 = vmul.f32 %v499_v16, %v1592_v29 }
 0x13c   :  { %v892_v46 = vadd.f32 1.0, %v1117_v35  ;;  %v425_v11 = vmul.f32 %v1213_v4, %v1902_v48  ;;  %v538_v3 = vmul.f32 %v537_v56, %v1636_v34  ;;  %v907_v8 = vmul.f32 %v891_v0, %v2095_v40 }
 0x13d   :  { %v1941_v7 = vadd.f32 1.0, %v742_v25  ;;  %v782_v28 = vmul.f32 %v781_v59, %v1579_v5  ;;  %v501_v45 = vadd.f32 0.4994258, %v500_v62  ;;  %v815_v15 = vadd.f32 0.001143296, %v814_v24 }
 0x13e   :  { %v1215_v38 = vpop.eup %1214  ;;  %v908_v49 = vmul.f32 %v892_v46, %v2096_v23  ;;  %v426_v55 = vsub.f32 1.0, %v425_v11  ;;  %v539_v6 = vadd.f32 0.112945676, %v538_v3  ;;  %vm1945_vm1 = vcmp.eq.f32.partialorder %v433_v18, 8.507059e+37 }
 0x13f   :  { %v465_v41 = vmul.f32 %v1215_v38, %v1910_v63  ;;  %v473_v10 = vand.u32 2147483647, %v1910_v63  ;;  %1216 = vrcp.f32 %v1941_v7  ;;  %vm430_vm2 = vweird.f32 %v1213_v4 }
 0x140   :  { %v918_v58 = vpack.c.bf16 %v908_v49, %v907_v8  ;;  %v427_v37 = vmul.f32 %v1213_v4, %v426_v55  ;;  %v475_v5 = vand.u32 2147483648, %v1910_v63  ;;  %v1953_v53 = vadd.f32 1.0, %v782_v28  ;;  %vm431_vm4 = vmor %vm429_vm0, %vm430_vm2 }
 0x141   :  { %v466_v26 = vsub.f32 1.0, %v465_v41  ;;  %v502_v61 = vmul.f32 %v501_v45, %v1592_v29  ;;  %v540_v31 = vmul.f32 %v539_v6, %v1636_v34  ;;  %v436_v43 = vor.u32 1.1754944e-38, %v435_v1 }
 0x142   :  { %1022 = vmatmul.bf16.gmra.mxu3 %v918_v58  ;;  %v428_v12 = vadd.f32 %v1213_v4, %v427_v37  ;;  %vm469_vm3 = vweird.f32 %v1910_v63  ;;  %v816_v21 = vmul.f32 %v815_v15, %v1617_v22  ;;  %vm470_vm5 = vweird.f32 %v1215_v38 }
 0x143   :  { %v467_v14 = vmul.f32 %v1215_v38, %v466_v26  ;;  %v753_v39 = vand.u32 2147483647, %v1941_v7  ;;  %1218 = vrcp.f32 %v1953_v53  ;;  %vm1963_vm6 = vcmp.eq.f32.partialorder %v473_v10, 8.507059e+37  ;;  %vm471_vm7 = vmor %vm469_vm3, %vm470_vm5  ;;  %v2105_v10 = vld [vmem:[#allocation23_spill] sm:$0xff] }
 0x144   :  { %v432_v32 = vsel %vm431_vm4, %v1213_v4, %v428_v12  ;;  %v476_v42 = vor.u32 1.1754944e-38, %v475_v5  ;;  %v1967_v20 = vadd.f32 1.0, %v502_v61  ;;  %v541_v30 = vadd.f32 0.4994258, %v540_v31 }
 0x145   :  { %v1217_v19 = vpop.eup %1216  ;;  %v437_v2 = vsel %vm1945_vm1, %v436_v43, %v432_v32  ;;  %v468_v48 = vadd.f32 %v1215_v38, %v467_v14  ;;  %v817_v9 = vadd.f32 0.014752088, %v816_v21  ;;  %v755_v27 = vand.u32 2147483648, %v1941_v7 }
 0x146   :  { %v438_v52 = vmul.f32 %v437_v2, %v1732_v51  ;;  %v745_v0 = vmul.f32 %v1217_v19, %v1941_v7  ;;  %v854_v57 = vmul.f32 3.8918573e-05, %v1679_v60  ;;  %vm749_vm8 = vweird.f32 %v1941_v7 }
 0x147   :  { %v472_v16 = vsel %vm471_vm7, %v1215_v38, %v468_v48  ;;  %vm1978_vm9 = vcmp.eq.f32.partialorder %v753_v39, 8.507059e+37  ;;  %1220 = vrcp.f32 %v1967_v20  ;;  %v793_v24 = vand.u32 2147483647, %v1953_v53 }
 0x148   :  { %v1110_v56 = vclamps-f32 %v438_v52, 1.0  ;;  %v477_v51 = vsel %vm1963_vm6, %v476_v42, %v472_v16  ;;  %v746_v63 = vsub.f32 1.0, %v745_v0  ;;  %v795_v25 = vand.u32 2147483648, %v1953_v53 }
 0x149   :  { %v1219_v4 = vpop.eup %1218  ;;  %v478_v18 = vmul.f32 %v477_v51, %v1756_v50  ;;  %v542_v59 = vmul.f32 %v541_v30, %v1636_v34  ;;  %v818_v62 = vmul.f32 %v817_v9, %v1617_v22  ;;  %vm750_vm10 = vweird.f32 %v1217_v19 }
 0x14a   :  { %v747_v46 = vmul.f32 %v1217_v19, %v746_v63  ;;  %v756_v11 = vor.u32 1.1754944e-38, %v755_v27  ;;  %v785_v1 = vmul.f32 %v1219_v4, %v1953_v53  ;;  %v885_v40 = vadd.f32 1.0, %v1110_v56  ;;  %vm751_vm13 = vmor %vm749_vm8, %vm750_vm10 }
 0x14b   :  { %v1111_v3 = vclamps-f32 %v478_v18, 1.0  ;;  %vm789_vm11 = vweird.f32 %v1953_v53  ;;  %v1992_v8 = vadd.f32 1.0, %v542_v59  ;;  %vm1994_vm12 = vcmp.eq.f32.partialorder %v793_v24, 8.507059e+37 }
 0x14c   :  { %v748_v28 = vadd.f32 %v1217_v19, %v747_v46  ;;  %v786_v45 = vsub.f32 1.0, %v785_v1  ;;  %v819_v34 = vadd.f32 0.112945676, %v818_v62  ;;  %v796_v49 = vor.u32 1.1754944e-38, %v795_v25  ;;  %v2107_v25 = vld [vmem:[#allocation21_spill] sm:$0xff]  ;;  %v2108_v62 = vld [vmem:[#allocation24_spill] sm:$0xff] }
 0x14d   :  { %v1221_v38 = vpop.eup %1220  ;;  %v886_v23 = vadd.f32 1.0, %v1111_v3  ;;  %1222 = vrcp.f32 %v1992_v8  ;;  %v855_v55 = vadd.f32 0.001143296, %v854_v57  ;;  %vm790_vm14 = vweird.f32 %v1219_v4  ;;  %v2109_v3 = vld [vmem:[#allocation19_spill] sm:$0xff] }
 0x14e   :  { %v752_v6 = vsel %vm751_vm13, %v1217_v19, %v748_v28  ;;  %v787_v15 = vmul.f32 %v1219_v4, %v786_v45  ;;  %v505_v17 = vmul.f32 %v1221_v38, %v1967_v20  ;;  %v901_v41 = vmul.f32 %v885_v40, %v1639_v47  ;;  %vm791_vm15 = vmor %vm789_vm11, %vm790_vm14 }
 0x14f   :  { %v902_v58 = vmul.f32 %v886_v23, %v2105_v10  ;;  %v757_v37 = vsel %vm1978_vm9, %v756_v11, %v752_v6  ;;  %v513_v5 = vand.u32 2147483647, %v1967_v20  ;;  %v820_v31 = vmul.f32 %v819_v34, %v1617_v22 }
 0x150   :  { %v758_v7 = vmul.f32 %v757_v37, %v1736_v36  ;;  %v788_v26 = vadd.f32 %v1219_v4, %v787_v15  ;;  %v506_v61 = vsub.f32 1.0, %v505_v17  ;;  %vm510_vm0 = vweird.f32 %v1221_v38 }
 0x151   :  { %v915_v12 = vpack.c.bf16 %v902_v58, %v901_v41  ;;  %v515_v47 = vand.u32 2147483648, %v1967_v20  ;;  %v856_v43 = vmul.f32 %v855_v55, %v1679_v60  ;;  %v821_v32 = vadd.f32 0.4994258, %v820_v31  ;;  %v2110_v58 = vld [vmem:[#allocation13_spill] sm:$0xff] }
 0x152   :  { %v1118_v21 = vclamps-f32 %v758_v7, 1.0  ;;  %v792_v14 = vsel %vm791_vm15, %v1219_v4, %v788_v26  ;;  %v507_v39 = vmul.f32 %v1221_v38, %v506_v61  ;;  %v532_v36 = vadd.f32 1.1283791, %v1923_v54  ;;  %v2106_v4 = vld [vmem:[#allocation25_spill] sm:$0xff] }
 0x153   :  { %v1223_v29 = vpop.eup %1222  ;;  %1007 = vmatmul.bf16.gmra.mxu1 %v915_v12  ;;  %v797_v42 = vsel %vm1994_vm12, %v796_v49, %v792_v14  ;;  %vm509_vm1 = vweird.f32 %v1967_v20  ;;  %v857_v53 = vadd.f32 0.014752088, %v856_v43  ;;  %vm514_vm2 = vcmp.eq.f32.partialorder %v513_v5, 8.507059e+37  ;;  %v2111_v5 = vld [vmem:[#allocation17_spill] sm:$0xff] }
 0x154   :  { %v798_v19 = vmul.f32 %v797_v42, %v1916_v44  ;;  %v508_v2 = vadd.f32 %v1221_v38, %v507_v39  ;;  %v545_v48 = vmul.f32 %v1223_v29, %v1992_v8  ;;  %vm511_vm3 = vmor %vm509_vm1, %vm510_vm0  ;;  %v516_v30 = vor.u32 1.1754944e-38, %v515_v47 }
 0x155   :  { %v553_v9 = vand.u32 2147483647, %v1992_v8  ;;  %v822_v54 = vmul.f32 %v821_v32, %v1617_v22  ;;  %v858_v52 = vmul.f32 %v857_v53, %v1679_v60  ;;  %v893_v27 = vadd.f32 1.0, %v1118_v21 }
 0x156   :  { %v1119_v0 = vclamps-f32 %v798_v19, 1.0  ;;  %v512_v57 = vsel %vm511_vm3, %v1221_v38, %v508_v2  ;;  %v546_v20 = vsub.f32 1.0, %v545_v48  ;;  %v555_v44 = vand.u32 2147483648, %v1992_v8 }
 0x157   :  { %v517_v16 = vsel %vm514_vm2, %v516_v30, %v512_v57  ;;  %v823_v35 = vadd.f32 1.0, %v822_v54  ;;  %v859_v56 = vadd.f32 0.112945676, %v858_v52  ;;  %vm550_vm4 = vweird.f32 %v1223_v29  ;;  %v2112_v30 = vld [vmem:[#allocation18_spill] sm:$0xff] }
 0x158   :  { %v894_v51 = vadd.f32 1.0, %v1119_v0  ;;  %v518_v63 = vmul.f32 %v517_v16, %v1920_v13  ;;  %v547_v24 = vmul.f32 %v1223_v29, %v546_v20  ;;  %v809_v18 = vmul.f32 %v2106_v4, %v1617_v22 }
 0x159   :  { %vm549_vm5 = vweird.f32 %v1992_v8  ;;  %1224 = vrcp.f32 %v823_v35  ;;  %v909_v59 = vmul.f32 %v893_v27, %v2107_v25  ;;  %v860_v1 = vmul.f32 %v859_v56, %v1679_v60  ;;  %v2114_v25 = vld [vmem:[#allocation16_spill] sm:$0xff] }
 0x15a   :  { %v910_v46 = vmul.f32 %v894_v51, %v2108_v62  ;;  %v548_v11 = vadd.f32 %v1223_v29, %v547_v24  ;;  %v533_v40 = vmul.f32 %v532_v36, %v2109_v3  ;;  %v848_v28 = vadd.f32 0.05243302, %v1927_v33  ;;  %vm551_vm6 = vmor %vm549_vm5, %vm550_vm4  ;;  %v2115_v62 = vld [vmem:[#allocation20_spill] sm:$0xff] }
 0x15b   :  { %vm554_vm7 = vcmp.eq.f32.partialorder %v553_v9, 8.507059e+37  ;;  %v556_v13 = vor.u32 1.1754944e-38, %v555_v44  ;;  %v1112_v50 = vclamps-f32 %v518_v63, 1.0  ;;  %v861_v38 = vadd.f32 0.4994258, %v860_v1 }
 0x15c   :  { %v919_v45 = vpack.c.bf16 %v910_v46, %v909_v59  ;;  %v552_v34 = vsel %vm551_vm6, %v1223_v29, %v548_v11  ;;  %v810_v6 = vadd.f32 0.18741608, %v809_v18  ;;  %v849_v15 = vmul.f32 %v848_v28, %v1679_v60  ;;  %v1195_v28 = vld [vmem:[%s2056_s4] ss:$0 sm:$0xff]  ;;  %s1337_s4 = smov [#allocation8]  }
 0x15d   :  { %v557_v8 = vsel %vm554_vm7, %v556_v13, %v552_v34  ;;  %v862_v49 = vmul.f32 %v861_v38, %v1679_v60  ;;  %v887_v41 = vadd.f32 1.0, %v1112_v50  ;;  %v215_v37 = vmul.f32 0.5, %v2110_v58  ;;  %s1058_s12 = sshll.u32 %s1337_s4, 4  ;;  %s1059_s12 = int_to_ptr.vmem [resolvable:$true] %s1058_s12 }
 0x15e   :  { %1027 = vmatmul.bf16.gmra.mxu3 %v919_v45  ;;  %v558_v23 = vmul.f32 %v557_v8, %v533_v40  ;;  %v216_v7 = vmul.f32 0.5, %v2111_v5  ;;  %v811_v31 = vmul.f32 %v810_v6, %v1617_v22  ;;  %v850_v12 = vadd.f32 0.18741608, %v849_v15 }
 0x15f   :  { %v1225_v55 = vpop.eup %1224  ;;  %v863_v33 = vadd.f32 1.0, %v862_v49  ;;  %v835_v47 = vand.u32 2147483648, %v823_v35  ;;  %v903_v43 = vmul.f32 %v887_v41, %v215_v37  ;;  %v833_v39 = vand.u32 2147483647, %v823_v35 }
 0x160   :  { %v1113_v17 = vclamps-f32 %v558_v23, 1.0  ;;  %v825_v10 = vmul.f32 %v1225_v55, %v823_v35  ;;  %vm830_vm8 = vweird.f32 %v1225_v55  ;;  %vm829_vm9 = vweird.f32 %v823_v35 }
 0x161   :  { %1226 = vrcp.f32 %v863_v33  ;;  %v812_v36 = vadd.f32 1.1283791, %v811_v31  ;;  %vm831_vm10 = vmor %vm829_vm9, %vm830_vm8  ;;  %v851_v53 = vmul.f32 %v850_v12, %v1679_v60  ;;  %v836_v2 = vor.u32 1.1754944e-38, %v835_v47  ;;  %v2113_v60 = vld [vmem:[#allocation22_spill] sm:$0xff] }
 0x162   :  { %v888_v26 = vadd.f32 1.0, %v1113_v17  ;;  %v826_v61 = vsub.f32 1.0, %v825_v10  ;;  %vm834_vm11 = vcmp.eq.f32.partialorder %v833_v39, 8.507059e+37  ;;  %v875_v0 = vand.u32 2147483648, %v863_v33 }
 0x163   :  { %v813_v9 = vmul.f32 %v812_v36, %v2112_v30  ;;  %v852_v52 = vadd.f32 1.1283791, %v851_v53  ;;  %v873_v20 = vand.u32 2147483647, %v863_v33  ;;  %vm869_vm13 = vweird.f32 %v863_v33 }
 0x164   :  { %v904_v21 = vmul.f32 %v888_v26, %v216_v7  ;;  %v827_v14 = vmul.f32 %v1225_v55, %v826_v61  ;;  %v876_v44 = vor.u32 1.1754944e-38, %v875_v0  ;;  %v223_v59 = vmul.f32 0.5, %v2114_v25 }
 0x165   :  { %v853_v35 = vmul.f32 %v852_v52, %v2113_v60  ;;  %vm874_vm15 = vcmp.eq.f32.partialorder %v873_v20, 8.507059e+37  ;;  %v224_v46 = vmul.f32 0.5, %v2115_v62 }
 0x166   :  { %v916_v32 = vpack.c.bf16 %v904_v21, %v903_v43  ;;  %v828_v29 = vadd.f32 %v1225_v55, %v827_v14 }
 0x167   :  { %v1227_v42 = vpop.eup %1226 }
 0x168   :  { %1012 = vmatmul.bf16.gmra.mxu1 %v916_v32  ;;  %v832_v19 = vsel %vm831_vm10, %v1225_v55, %v828_v29  ;;  %v865_v22 = vmul.f32 %v1227_v42, %v863_v33  ;;  %vm870_vm12 = vweird.f32 %v1227_v42 }
 0x169   :  { %v837_v48 = vsel %vm834_vm11, %v836_v2, %v832_v19  ;;  %vm871_vm14 = vmor %vm869_vm13, %vm870_vm12 }
 0x16a   :  { %v866_v54 = vsub.f32 1.0, %v865_v22  ;;  %v838_v27 = vmul.f32 %v837_v48, %v813_v9 }
 0x16c   :  { %v867_v57 = vmul.f32 %v1227_v42, %v866_v54  ;;  %v1120_v56 = vclamps-f32 %v838_v27, 1.0 }
 0x16e   :  { %v868_v16 = vadd.f32 %v1227_v42, %v867_v57  ;;  %v895_v18 = vadd.f32 1.0, %v1120_v56 }
 0x170   :  { %v872_v51 = vsel %vm871_vm14, %v1227_v42, %v868_v16  ;;  %v911_v1 = vmul.f32 %v895_v18, %v223_v59 }
 0x171   :  { %v877_v63 = vsel %vm874_vm15, %v876_v44, %v872_v51 }
 0x172   :  { %v878_v24 = vmul.f32 %v877_v63, %v853_v35 }
 0x174   :  { %v1121_v4 = vclamps-f32 %v878_v24, 1.0 }
 0x176   :  { %v896_v11 = vadd.f32 1.0, %v1121_v4 }
 0x178   :  { %v912_v3 = vmul.f32 %v896_v11, %v224_v46 }
 0x17a   :  { %v920_v40 = vpack.c.bf16 %v912_v3, %v911_v1 }
 0x17c   :  { %1032 = vmatmul.bf16.gmra.mxu3 %v920_v40 }
 0x19e   :  { %v998_v13 = vpop.f32.mrf.mxu1 }
 0x19f   :  { %v999_v45 = vadd.f32 %v1195_v28, %v998_v13 }
 0x1a1   :  { %1038 = vst [vmem:[#allocation8] sm:$0xff] %v999_v45 }
 0x1a6   :  { %v1000_v50 = vpop.f32.mrf.mxu1 }
 0x1a7   :  { %v1001_v34 = vadd.f32 %v1195_v28, %v1000_v50 }
 0x1a9   :  { %1039 = vst [vmem:[#allocation8 + $0x8] sm:$0xff] %v1001_v34 }
 0x1ad   :  { %v1018_v38 = vpop.f32.mrf.mxu3 }
 0x1ae   :  { %v1019_v8 = vadd.f32 %v1195_v28, %v1018_v38  ;;  %v1003_v23 = vpop.f32.mrf.mxu1 }
 0x1af   :  { %v1004_v49 = vadd.f32 %v1195_v28, %v1003_v23 }
 0x1b0   :  { %1046 = vst [vmem:[#allocation8 + $0x40] sm:$0xff] %v1019_v8 }
 0x1b1   :  { %1040 = vst [vmem:[#allocation8 + $0x10] sm:$0xff] %v1004_v49 }
 0x1b5   :  { %v1020_v55 = vpop.f32.mrf.mxu3 }
 0x1b6   :  { %v1021_v6 = vadd.f32 %v1195_v28, %v1020_v55  ;;  %v1005_v15 = vpop.f32.mrf.mxu1 }
 0x1b7   :  { %v1006_v17 = vadd.f32 %v1195_v28, %v1005_v15 }
 0x1b8   :  { %1047 = vst [vmem:[#allocation8 + $0x48] sm:$0xff] %v1021_v6 }
 0x1b9   :  { %1041 = vst [vmem:[#allocation8 + $0x18] sm:$0xff] %v1006_v17 }
 0x1c5   :  { %v1023_v41 = vpop.f32.mrf.mxu3 }
 0x1c6   :  { %v1024_v10 = vadd.f32 %v1195_v28, %v1023_v41 }
 0x1c8   :  { %1048 = vst [vmem:[#allocation8 + $0x50] sm:$0xff] %v1024_v10 }
 0x1cd   :  { %v1025_v33 = vpop.f32.mrf.mxu3 }
 0x1ce   :  { %v1026_v58 = vadd.f32 %v1195_v28, %v1025_v33 }
 0x1d0   :  { %v1008_v37 = vpop.f32.mrf.mxu1  ;;  %1049 = vst [vmem:[#allocation8 + $0x58] sm:$0xff] %v1026_v58 }
 0x1d1   :  { %v1009_v5 = vadd.f32 %v1195_v28, %v1008_v37 }
 0x1d3   :  { %1042 = vst [vmem:[#allocation8 + $0x20] sm:$0xff] %v1009_v5 }
 0x1d8   :  { %v1010_v7 = vpop.f32.mrf.mxu1 }
 0x1d9   :  { %v1011_v26 = vadd.f32 %v1195_v28, %v1010_v7 }
 0x1db   :  { %1043 = vst [vmem:[#allocation8 + $0x28] sm:$0xff] %v1011_v26 }
 0x1e1   :  { %v1028_v61 = vpop.f32.mrf.mxu3 }
 0x1e2   :  { %v1029_v31 = vadd.f32 %v1195_v28, %v1028_v61 }
 0x1e4   :  { %1050 = vst [vmem:[#allocation8 + $0x60] sm:$0xff] %v1029_v31 }
 0x1e5   :  { %v1013_v12 = vpop.f32.mrf.mxu1 }
 0x1e6   :  { %v1014_v47 = vadd.f32 %v1195_v28, %v1013_v12 }
 0x1e8   :  { %1044 = vst [vmem:[#allocation8 + $0x30] sm:$0xff] %v1014_v47 }
 0x1e9   :  { %v1030_v43 = vpop.f32.mrf.mxu3 }
 0x1ea   :  { %v1031_v21 = vadd.f32 %v1195_v28, %v1030_v43 }
 0x1ec   :  { %1051 = vst [vmem:[#allocation8 + $0x68] sm:$0xff] %v1031_v21 }
 0x1ed   :  { %v1015_v14 = vpop.f32.mrf.mxu1 }
 0x1ee   :  { %v1016_v39 = vadd.f32 %v1195_v28, %v1015_v14 }
 0x1f0   :  { %1045 = vst [vmem:[#allocation8 + $0x38] sm:$0xff] %v1016_v39 }
 0x1ff   :  { %v1033_v32 = vpop.f32.mrf.mxu3 }
 0x200   :  { %v1034_v29 = vadd.f32 %v1195_v28, %v1033_v32 }
 0x202   :  { %1052 = vst [vmem:[#allocation8 + $0x70] sm:$0xff] %v1034_v29 }
 0x207   :  { %v1035_v36 = vpop.f32.mrf.mxu3 }
 0x208   :  { %v1036_v42 = vadd.f32 %v1195_v28, %v1035_v36 }
 0x20a   :  { %1053 = vst [vmem:[#allocation8 + $0x78] sm:$0xff] %v1036_v42 }
 0x20b   :  { %1066 = dma.vmem_to_hbm [thread:$0]  %s1059_s12, 2048, %s1061_s15, [#allocation4], %s1334_s30, %s1334_s30, %s1335_s6  }
 0x20c   :  { %1328 = dma.done.wait [#allocation4], 2048  }
 0x20d   :  { %1329 = vsyncadd [#allocation4], 4294965248 }
 0x20e   :  { %1071 = vsyncpa [#allocation3], 1 }
 0x20f   :  { %1072 = vsyncpa [#allocation6], 1 }
 0x210   :  { %1073 = vsyncpa [#allocation4], 1 }

</bundles_post_ra>
